<compile_context>
chip_gen: v5e
topology: v5e:2x2
jax: 0.10.0
libtpu: 0.0.40
codegen_flags: <defaults>
</compile_context>

<pallas_src>
import functools
import math

import jax
import jax.numpy as jnp
from jax.experimental import pallas as pl
from jax.experimental.pallas import tpu as pltpu


def _rup(x, m):
    return (x + m - 1) // m * m


def _row_tile(M):
    """Row tiling for elementwise kernels: lane-dense, multiple-of-128 rows."""
    Mp = _rup(M, 128)
    if Mp <= 1024:
        return Mp, Mp
    for tm in (1024, 512, 256, 128):
        if Mp % tm == 0:
            return Mp, tm
    return Mp, 128


# ---------------------------------------------------------------------------
# bf16 matmul (f32 accumulation) with fused per-channel BN statistics.
# ---------------------------------------------------------------------------
def _mm_bn_kernel(a_ref, b_ref, o_ref, s_ref, ss_ref, acc_ref):
    @pl.when(pl.program_id(2) == 0)
    def _():
        acc_ref[...] = jnp.zeros_like(acc_ref)

    acc_ref[...] += jnp.dot(a_ref[...], b_ref[...],
                            preferred_element_type=jnp.float32)

    @pl.when(pl.program_id(2) == pl.num_programs(2) - 1)
    def _():
        acc = acc_ref[...]
        o_ref[...] = acc.astype(o_ref.dtype)
        # Per-tile column statistics, replicated over 8 sublanes so the stats
        # output block keeps an (8, 128)-friendly shape.
        cs = jnp.sum(acc, axis=0, keepdims=True)
        ss = jnp.sum(acc * acc, axis=0, keepdims=True)
        s_ref[...] = jnp.broadcast_to(cs, s_ref.shape)
        ss_ref[...] = jnp.broadcast_to(ss, ss_ref.shape)


@functools.lru_cache(maxsize=None)
def _mm_bn_call(Mp, Kp, Np, tm, tk, tn):
    mt, nt, kt = Mp // tm, Np // tn, Kp // tk
    f = pl.pallas_call(
        _mm_bn_kernel,
        out_shape=(jax.ShapeDtypeStruct((Mp, Np), jnp.bfloat16),
                   jax.ShapeDtypeStruct((8 * mt, Np), jnp.float32),
                   jax.ShapeDtypeStruct((8 * mt, Np), jnp.float32)),
        grid=(mt, nt, kt),
        in_specs=[pl.BlockSpec((tm, tk), lambda i, j, k: (i, k)),
                  pl.BlockSpec((tk, tn), lambda i, j, k: (k, j))],
        out_specs=(pl.BlockSpec((tm, tn), lambda i, j, k: (i, j)),
                   pl.BlockSpec((8, tn), lambda i, j, k: (i, j)),
                   pl.BlockSpec((8, tn), lambda i, j, k: (i, j))),
        scratch_shapes=[pltpu.VMEM((tm, tn), jnp.float32)],
        compiler_params=pltpu.CompilerParams(
            dimension_semantics=("parallel", "parallel", "arbitrary")),
    )
    return jax.jit(f)


def conv1x1_bn_stats(x, w):
    """1x1 conv (no bias) on NHWC x with weights (Cin, Cout).

    Returns bf16 NHWC output plus f32 per-channel sum / sum-of-squares of the conv
    output (for fused batch-norm) and the element count.
    """
    N, H, W, Cin = x.shape
    Cout = w.shape[1]
    M = N * H * W
    Mp, Kp, Np = _rup(M, 128), _rup(Cin, 128), _rup(Cout, 128)
    tm = 256 if Mp % 256 == 0 else 128
    tk = 256 if Kp % 256 == 0 else 128
    tn = 256 if Np % 256 == 0 else 128   # 256-wide tiles fill the 256x256 MXU (v6e/v7x)

    a = x.reshape(M, Cin).astype(jnp.bfloat16)
    if Mp != M or Kp != Cin:
        a = jnp.pad(a, ((0, Mp - M), (0, Kp - Cin)))
    b = w.astype(jnp.bfloat16)
    if Kp != Cin or Np != Cout:
        b = jnp.pad(b, ((0, Kp - Cin), (0, Np - Cout)))

    y, s, ss = _mm_bn_call(Mp, Kp, Np, tm, tk, tn)(a, b)
    y = y[:M, :Cout].reshape(N, H, W, Cout)
    col_sum = jnp.sum(s, axis=0)[:Cout] / 8.0   # un-replicate the 8 sublane copies
    col_ssq = jnp.sum(ss, axis=0)[:Cout] / 8.0
    return y, col_sum, col_ssq, M


def bn_affine_coeffs(col_sum, col_ssq, count, gamma, beta, eps=1e-5):
    # Training-mode batch stats (biased variance), like a freshly built torch BN.
    mean = col_sum / count
    var = jnp.maximum(col_ssq / count - mean * mean, 0.0)  # guard E[x^2]-E[x]^2 cancellation
    a = gamma * jax.lax.rsqrt(var + eps)
    return a, beta - mean * a


# ---------------------------------------------------------------------------
# Depthwise 3x3 conv (stride 1, pad 1), taps formed in-kernel; optional fused
# pre-ReLU on the input.  One padded image block per grid step.
# ---------------------------------------------------------------------------
def _dw_kernel(x_ref, w_ref, o_ref, *, H, W, pre_relu):
    acc = jnp.zeros((H, W, x_ref.shape[-1]), jnp.float32)
    for t in range(9):
        dy, dx = t // 3, t % 3
        tap = x_ref[0, dy:dy + H, dx:dx + W, :].astype(jnp.float32)
        if pre_relu:
            tap = jnp.maximum(tap, 0.0)
        acc = acc + tap * w_ref[t]
    o_ref[0] = acc.astype(o_ref.dtype)


@functools.lru_cache(maxsize=None)
def _dw_call(N, H, W, C, in_dtype, pre_relu):
    f = pl.pallas_call(
        functools.partial(_dw_kernel, H=H, W=W, pre_relu=pre_relu),
        out_shape=jax.ShapeDtypeStruct((N, H, W, C), jnp.bfloat16),
        grid=(N,),
        in_specs=[pl.BlockSpec((1, H + 2, W + 2, C), lambda n: (n, 0, 0, 0)),
                  pl.BlockSpec((9, 1, 1, C), lambda n: (0, 0, 0, 0))],
        out_specs=pl.BlockSpec((1, H, W, C), lambda n: (n, 0, 0, 0)),
        compiler_params=pltpu.CompilerParams(dimension_semantics=("parallel",)),
    )
    return jax.jit(f)


def depthwise3x3(x, w9c, pre_relu):
    N, H, W, C = x.shape
    xp = jnp.pad(x, ((0, 0), (1, 1), (1, 1), (0, 0)))  # relu(0)=0, so pad-then-relu is safe
    w = w9c.reshape(9, 1, 1, C).astype(jnp.float32)
    return _dw_call(N, H, W, C, str(x.dtype), pre_relu)(xp, w)


# ---------------------------------------------------------------------------
# 3x3 max pool (pad 1): stride-1 window max in-kernel, strided pick in glue.
# ---------------------------------------------------------------------------
def _pool_kernel(x_ref, o_ref, *, H, W):
    m = x_ref[0, 0:H, 0:W, :]
    for t in range(1, 9):
        dy, dx = t // 3, t % 3
        m = jnp.maximum(m, x_ref[0, dy:dy + H, dx:dx + W, :])
    o_ref[0] = m.astype(o_ref.dtype)


@functools.lru_cache(maxsize=None)
def _pool_call(N, H, W, C, dtype_name):
    dt = jnp.dtype(dtype_name)
    f = pl.pallas_call(
        functools.partial(_pool_kernel, H=H, W=W),
        out_shape=jax.ShapeDtypeStruct((N, H, W, C), dt),
        grid=(N,),
        in_specs=[pl.BlockSpec((1, H + 2, W + 2, C), lambda n: (n, 0, 0, 0))],
        out_specs=pl.BlockSpec((1, H, W, C), lambda n: (n, 0, 0, 0)),
        compiler_params=pltpu.CompilerParams(dimension_semantics=("parallel",)),
    )
    return jax.jit(f)


def maxpool3x3(x, stride):
    N, H, W, C = x.shape
    xp = jnp.pad(x, ((0, 0), (1, 1), (1, 1), (0, 0)), constant_values=-jnp.inf)
    m = _pool_call(N, H, W, C, str(x.dtype))(xp)
    return m[:, ::stride, ::stride, :]


# ---------------------------------------------------------------------------
# Fused elementwise epilogues: BN affine (+ReLU), and BN affine(s) + residual add.
# ---------------------------------------------------------------------------
def _affine_kernel(x_ref, a_ref, b_ref, o_ref, *, relu):
    y = x_ref[...].astype(jnp.float32) * a_ref[...] + b_ref[...]
    if relu:
        y = jnp.maximum(y, 0.0)
    o_ref[...] = y.astype(o_ref.dtype)


@functools.lru_cache(maxsize=None)
def _affine_call(Mp, C, tm, relu, in_dtype, out_dtype):
    f = pl.pallas_call(
        functools.partial(_affine_kernel, relu=relu),
        out_shape=jax.ShapeDtypeStruct((Mp, C), jnp.dtype(out_dtype)),
        grid=(Mp // tm,),
        in_specs=[pl.BlockSpec((tm, C), lambda i: (i, 0)),
                  pl.BlockSpec((1, C), lambda i: (0, 0)),
                  pl.BlockSpec((1, C), lambda i: (0, 0))],
        out_specs=pl.BlockSpec((tm, C), lambda i: (i, 0)),
        compiler_params=pltpu.CompilerParams(dimension_semantics=("parallel",)),
    )
    return jax.jit(f)


def bn_affine(x, a, b, relu=False, out_dtype=jnp.bfloat16):
    N, H, W, C = x.shape
    M = N * H * W
    Mp, tm = _row_tile(M)
    x2 = x.reshape(M, C)
    if Mp != M:
        x2 = jnp.pad(x2, ((0, Mp - M), (0, 0)))
    out = _affine_call(Mp, C, tm, relu, str(x.dtype), jnp.dtype(out_dtype).name)(
        x2, a.reshape(1, C).astype(jnp.float32), b.reshape(1, C).astype(jnp.float32))
    return out[:M].reshape(N, H, W, C)


def _affine2_kernel(x_ref, a_ref, b_ref, y_ref, c_ref, d_ref, o_ref):
    o_ref[...] = (x_ref[...].astype(jnp.float32) * a_ref[...] + b_ref[...]
                  + y_ref[...].astype(jnp.float32) * c_ref[...] + d_ref[...]
                  ).astype(o_ref.dtype)


@functools.lru_cache(maxsize=None)
def _affine2_call(Mp, C, tm, dt1, dt2):
    f = pl.pallas_call(
        _affine2_kernel,
        out_shape=jax.ShapeDtypeStruct((Mp, C), jnp.float32),
        grid=(Mp // tm,),
        in_specs=[pl.BlockSpec((tm, C), lambda i: (i, 0)),
                  pl.BlockSpec((1, C), lambda i: (0, 0)),
                  pl.BlockSpec((1, C), lambda i: (0, 0)),
                  pl.BlockSpec((tm, C), lambda i: (i, 0)),
                  pl.BlockSpec((1, C), lambda i: (0, 0)),
                  pl.BlockSpec((1, C), lambda i: (0, 0))],
        out_specs=pl.BlockSpec((tm, C), lambda i: (i, 0)),
        compiler_params=pltpu.CompilerParams(dimension_semantics=("parallel",)),
    )
    return jax.jit(f)


def bn_affine_add(x1, a1, b1, x2, a2, b2):
    """(x1*a1+b1) + (x2*a2+b2) -> f32.  Fused BN affine(s) + residual add."""
    N, H, W, C = x1.shape
    M = N * H * W
    Mp, tm = _row_tile(M)
    p1 = x1.reshape(M, C)
    p2 = x2.reshape(M, C)
    if Mp != M:
        p1 = jnp.pad(p1, ((0, Mp - M), (0, 0)))
        p2 = jnp.pad(p2, ((0, Mp - M), (0, 0)))
    out = _affine2_call(Mp, C, tm, str(x1.dtype), str(x2.dtype))(
        p1, a1.reshape(1, C).astype(jnp.float32), b1.reshape(1, C).astype(jnp.float32),
        p2, a2.reshape(1, C).astype(jnp.float32), b2.reshape(1, C).astype(jnp.float32))
    return out[:M].reshape(N, H, W, C)


# ---------------------------------------------------------------------------
# Block parameters (deterministic synthetic init) and forward pass
# ---------------------------------------------------------------------------
class KeyGen:
    def __init__(self, seed=0):
        self._key = jax.random.PRNGKey(seed)

    def __call__(self):
        self._key, sub = jax.random.split(self._key)
        return sub


def make_block_params(kg, in_filters, out_filters, reps, strides=1,
                      start_with_relu=True, grow_first=True):
    """Mirror of torch Block.__init__ (synthetic weights; BN gamma=1, beta=0)."""
    if grow_first:
        chans = [(in_filters, out_filters)] + [(out_filters, out_filters)] * (reps - 1)
    else:
        chans = [(in_filters, in_filters)] * (reps - 1) + [(in_filters, out_filters)]
    seps = []
    for i, (ci, co) in enumerate(chans):
        seps.append(dict(
            pre_relu=(True if i > 0 else start_with_relu),
            dw=jax.random.normal(kg(), (9, ci), jnp.float32) * math.sqrt(2.0 / (9 * ci)),
            pw=jax.random.normal(kg(), (ci, co), jnp.float32) * math.sqrt(2.0 / ci),
            gamma=jnp.ones((co,), jnp.float32),
            beta=jnp.zeros((co,), jnp.float32)))
    blk = dict(seps=seps, strides=strides, skip=None)
    if out_filters != in_filters or strides != 1:
        blk["skip"] = dict(
            w=jax.random.normal(kg(), (in_filters, out_filters), jnp.float32)
              * math.sqrt(2.0 / in_filters),
            gamma=jnp.ones((out_filters,), jnp.float32),
            beta=jnp.zeros((out_filters,), jnp.float32))
    return blk


def block_forward(blk, x_nchw):
    """Forward of the torch `Block` module.  NCHW in, NCHW (f32) out."""
    inp = jnp.transpose(x_nchw, (0, 2, 3, 1)).astype(jnp.float32)   # -> NHWC
    seps = blk["seps"]
    strides = blk["strides"]
    n = len(seps)

    h = inp
    relu_fused = False
    pending = None
    for i, sp in enumerate(seps):
        pre = sp["pre_relu"] and not relu_fused
        h = depthwise3x3(h, sp["dw"], pre_relu=pre)          # bf16, fused pre-ReLU
        y, cs, css, cnt = conv1x1_bn_stats(h, sp["pw"])      # bf16 + fused BN stats
        a, b = bn_affine_coeffs(cs, css, cnt, sp["gamma"], sp["beta"])
        if i < n - 1:
            # fuse this BN's scale/shift with the next separable conv's pre-ReLU
            h = bn_affine(y, a, b, relu=True, out_dtype=jnp.bfloat16)
            relu_fused = True
        else:
            pending = (y, a, b)   # defer last BN affine so it can fuse with the add

    y_last, a_last, b_last = pending

    if strides != 1:
        hb = bn_affine(y_last, a_last, b_last, relu=False, out_dtype=jnp.bfloat16)
        hb = maxpool3x3(hb, strides)
    else:
        hb = None

    if blk["skip"] is not None:
        xs = inp[:, ::strides, ::strides, :] if strides != 1 else inp
        sy, scs, scss, scnt = conv1x1_bn_stats(xs, blk["skip"]["w"])
        sa, sb = bn_affine_coeffs(scs, scss, scnt,
                                  blk["skip"]["gamma"], blk["skip"]["beta"])
        ones = jnp.ones_like(sa)
        zeros = jnp.zeros_like(sb)
        if strides != 1:
            out = bn_affine_add(sy, sa, sb, hb, ones, zeros)          # skip BN + add
        else:
            out = bn_affine_add(y_last, a_last, b_last, sy, sa, sb)   # both BNs + add
    else:
        C = inp.shape[-1]
        ones = jnp.ones((C,), jnp.float32)
        zeros = jnp.zeros((C,), jnp.float32)
        out = bn_affine_add(y_last, a_last, b_last, inp, ones, zeros)  # BN + identity add

    return jnp.transpose(out, (0, 3, 1, 2))   # -> NCHW, f32


if __name__ == "__main__":
    kg = KeyGen(0)
    # Three configs exercise the three residual paths of Block:
    #   strided block with conv skip, identity-skip block, grow_first=False conv-skip.
    blk1 = make_block_params(kg, 8, 16, reps=2, strides=2,
                             start_with_relu=False, grow_first=True)
    blk2 = make_block_params(kg, 16, 16, reps=2, strides=1,
                             start_with_relu=True, grow_first=True)
    blk3 = make_block_params(kg, 16, 24, reps=2, strides=1,
                             start_with_relu=True, grow_first=False)

    x = jax.random.normal(jax.random.PRNGKey(0), (2, 8, 16, 16), jnp.float32)  # NCHW

    y1 = block_forward(blk1, x)       # (2, 16, 8, 8)
    y2 = block_forward(blk2, y1)      # (2, 16, 8, 8)
    y3 = block_forward(blk3, y2)      # (2, 24, 8, 8)
    y1, y2, y3 = jax.block_until_ready((y1, y2, y3))

    assert y1.shape == (2, 16, 8, 8), y1.shape
    assert y2.shape == (2, 16, 8, 8), y2.shape
    assert y3.shape == (2, 24, 8, 8), y3.shape
    assert all(bool(jnp.all(jnp.isfinite(t))) for t in (y1, y2, y3))

    print("KERNEL_OK")
</pallas_src>

<mosaic_0001>
module attributes {stable_mosaic.version = 11 : i64} {
  func.func @_dw_kernel(%arg0: i32, %arg1: memref<1x18x18x8xf32, #tpu.memory_space<vmem>>, %arg2: memref<9x1x1x8xf32, #tpu.memory_space<vmem>>, %arg3: memref<1x16x16x8xbf16, #tpu.memory_space<vmem>>) attributes {dimension_semantics = [#tpu.dimension_semantics<parallel>], iteration_bounds = array<i64: 2>, scalar_prefetch = 0 : i64, scratch_operands = 0 : i64, tpu.core_type = #tpu.core_type<tc>, window_params = [{transform_indices = @transform_0, window_bounds = array<i64: 1, 18, 18, 8>}, {pipeline_mode = #tpu.pipeline_mode<synchronous>, transform_indices = @transform_1, window_bounds = array<i64: 9, 1, 1, 8>}, {transform_indices = @transform_2, window_bounds = array<i64: 1, 16, 16, 8>}]} {
    %cst = arith.constant 0.000000e+00 : f32
    %0 = vector.broadcast %cst : f32 to vector<16x16x8xf32>
    %c0 = arith.constant 0 : index
    %c0_0 = arith.constant 0 : index
    %c0_1 = arith.constant 0 : index
    %c0_2 = arith.constant 0 : index
    %1 = vector.load %arg1[%c0, %c0_0, %c0_1, %c0_2] : memref<1x18x18x8xf32, #tpu.memory_space<vmem>>, vector<1x16x16x8xf32>
    %2 = vector.shape_cast %1 : vector<1x16x16x8xf32> to vector<16x16x8xf32>
    %c0_3 = arith.constant 0 : index
    %c0_4 = arith.constant 0 : index
    %c0_5 = arith.constant 0 : index
    %c0_6 = arith.constant 0 : index
    %3 = vector.load %arg2[%c0_3, %c0_4, %c0_5, %c0_6] : memref<9x1x1x8xf32, #tpu.memory_space<vmem>>, vector<1x1x1x8xf32>
    %4 = vector.shape_cast %3 : vector<1x1x1x8xf32> to vector<1x1x8xf32>
    %5 = vector.broadcast %4 : vector<1x1x8xf32> to vector<16x16x8xf32>
    %6 = arith.mulf %2, %5 : vector<16x16x8xf32>
    %7 = arith.addf %0, %6 : vector<16x16x8xf32>
    %c0_7 = arith.constant 0 : index
    %c0_8 = arith.constant 0 : index
    %c1 = arith.constant 1 : index
    %c0_9 = arith.constant 0 : index
    %8 = vector.load %arg1[%c0_7, %c0_8, %c1, %c0_9] : memref<1x18x18x8xf32, #tpu.memory_space<vmem>>, vector<1x16x16x8xf32>
    %9 = vector.shape_cast %8 : vector<1x16x16x8xf32> to vector<16x16x8xf32>
    %c1_10 = arith.constant 1 : index
    %c0_11 = arith.constant 0 : index
    %c0_12 = arith.constant 0 : index
    %c0_13 = arith.constant 0 : index
    %10 = vector.load %arg2[%c1_10, %c0_11, %c0_12, %c0_13] : memref<9x1x1x8xf32, #tpu.memory_space<vmem>>, vector<1x1x1x8xf32>
    %11 = vector.shape_cast %10 : vector<1x1x1x8xf32> to vector<1x1x8xf32>
    %12 = vector.broadcast %11 : vector<1x1x8xf32> to vector<16x16x8xf32>
    %13 = arith.mulf %9, %12 : vector<16x16x8xf32>
    %14 = arith.addf %7, %13 : vector<16x16x8xf32>
    %c0_14 = arith.constant 0 : index
    %c0_15 = arith.constant 0 : index
    %c2 = arith.constant 2 : index
    %c0_16 = arith.constant 0 : index
    %15 = vector.load %arg1[%c0_14, %c0_15, %c2, %c0_16] : memref<1x18x18x8xf32, #tpu.memory_space<vmem>>, vector<1x16x16x8xf32>
    %16 = vector.shape_cast %15 : vector<1x16x16x8xf32> to vector<16x16x8xf32>
    %c2_17 = arith.constant 2 : index
    %c0_18 = arith.constant 0 : index
    %c0_19 = arith.constant 0 : index
    %c0_20 = arith.constant 0 : index
    %17 = vector.load %arg2[%c2_17, %c0_18, %c0_19, %c0_20] : memref<9x1x1x8xf32, #tpu.memory_space<vmem>>, vector<1x1x1x8xf32>
    %18 = vector.shape_cast %17 : vector<1x1x1x8xf32> to vector<1x1x8xf32>
    %19 = vector.broadcast %18 : vector<1x1x8xf32> to vector<16x16x8xf32>
    %20 = arith.mulf %16, %19 : vector<16x16x8xf32>
    %21 = arith.addf %14, %20 : vector<16x16x8xf32>
    %c0_21 = arith.constant 0 : index
    %c1_22 = arith.constant 1 : index
    %c0_23 = arith.constant 0 : index
    %c0_24 = arith.constant 0 : index
    %22 = vector.load %arg1[%c0_21, %c1_22, %c0_23, %c0_24] : memref<1x18x18x8xf32, #tpu.memory_space<vmem>>, vector<1x16x16x8xf32>
    %23 = vector.shape_cast %22 : vector<1x16x16x8xf32> to vector<16x16x8xf32>
    %c3 = arith.constant 3 : index
    %c0_25 = arith.constant 0 : index
    %c0_26 = arith.constant 0 : index
    %c0_27 = arith.constant 0 : index
    %24 = vector.load %arg2[%c3, %c0_25, %c0_26, %c0_27] : memref<9x1x1x8xf32, #tpu.memory_space<vmem>>, vector<1x1x1x8xf32>
    %25 = vector.shape_cast %24 : vector<1x1x1x8xf32> to vector<1x1x8xf32>
    %26 = vector.broadcast %25 : vector<1x1x8xf32> to vector<16x16x8xf32>
    %27 = arith.mulf %23, %26 : vector<16x16x8xf32>
    %28 = arith.addf %21, %27 : vector<16x16x8xf32>
    %c0_28 = arith.constant 0 : index
    %c1_29 = arith.constant 1 : index
    %c1_30 = arith.constant 1 : index
    %c0_31 = arith.constant 0 : index
    %29 = vector.load %arg1[%c0_28, %c1_29, %c1_30, %c0_31] : memref<1x18x18x8xf32, #tpu.memory_space<vmem>>, vector<1x16x16x8xf32>
    %30 = vector.shape_cast %29 : vector<1x16x16x8xf32> to vector<16x16x8xf32>
    %c4 = arith.constant 4 : index
    %c0_32 = arith.constant 0 : index
    %c0_33 = arith.constant 0 : index
    %c0_34 = arith.constant 0 : index
    %31 = vector.load %arg2[%c4, %c0_32, %c0_33, %c0_34] : memref<9x1x1x8xf32, #tpu.memory_space<vmem>>, vector<1x1x1x8xf32>
    %32 = vector.shape_cast %31 : vector<1x1x1x8xf32> to vector<1x1x8xf32>
    %33 = vector.broadcast %32 : vector<1x1x8xf32> to vector<16x16x8xf32>
    %34 = arith.mulf %30, %33 : vector<16x16x8xf32>
    %35 = arith.addf %28, %34 : vector<16x16x8xf32>
    %c0_35 = arith.constant 0 : index
    %c1_36 = arith.constant 1 : index
    %c2_37 = arith.constant 2 : index
    %c0_38 = arith.constant 0 : index
    %36 = vector.load %arg1[%c0_35, %c1_36, %c2_37, %c0_38] : memref<1x18x18x8xf32, #tpu.memory_space<vmem>>, vector<1x16x16x8xf32>
    %37 = vector.shape_cast %36 : vector<1x16x16x8xf32> to vector<16x16x8xf32>
    %c5 = arith.constant 5 : index
    %c0_39 = arith.constant 0 : index
    %c0_40 = arith.constant 0 : index
    %c0_41 = arith.constant 0 : index
    %38 = vector.load %arg2[%c5, %c0_39, %c0_40, %c0_41] : memref<9x1x1x8xf32, #tpu.memory_space<vmem>>, vector<1x1x1x8xf32>
    %39 = vector.shape_cast %38 : vector<1x1x1x8xf32> to vector<1x1x8xf32>
    %40 = vector.broadcast %39 : vector<1x1x8xf32> to vector<16x16x8xf32>
    %41 = arith.mulf %37, %40 : vector<16x16x8xf32>
    %42 = arith.addf %35, %41 : vector<16x16x8xf32>
    %c0_42 = arith.constant 0 : index
    %c2_43 = arith.constant 2 : index
    %c0_44 = arith.constant 0 : index
    %c0_45 = arith.constant 0 : index
    %43 = vector.load %arg1[%c0_42, %c2_43, %c0_44, %c0_45] : memref<1x18x18x8xf32, #tpu.memory_space<vmem>>, vector<1x16x16x8xf32>
    %44 = vector.shape_cast %43 : vector<1x16x16x8xf32> to vector<16x16x8xf32>
    %c6 = arith.constant 6 : index
    %c0_46 = arith.constant 0 : index
    %c0_47 = arith.constant 0 : index
    %c0_48 = arith.constant 0 : index
    %45 = vector.load %arg2[%c6, %c0_46, %c0_47, %c0_48] : memref<9x1x1x8xf32, #tpu.memory_space<vmem>>, vector<1x1x1x8xf32>
    %46 = vector.shape_cast %45 : vector<1x1x1x8xf32> to vector<1x1x8xf32>
    %47 = vector.broadcast %46 : vector<1x1x8xf32> to vector<16x16x8xf32>
    %48 = arith.mulf %44, %47 : vector<16x16x8xf32>
    %49 = arith.addf %42, %48 : vector<16x16x8xf32>
    %c0_49 = arith.constant 0 : index
    %c2_50 = arith.constant 2 : index
    %c1_51 = arith.constant 1 : index
    %c0_52 = arith.constant 0 : index
    %50 = vector.load %arg1[%c0_49, %c2_50, %c1_51, %c0_52] : memref<1x18x18x8xf32, #tpu.memory_space<vmem>>, vector<1x16x16x8xf32>
    %51 = vector.shape_cast %50 : vector<1x16x16x8xf32> to vector<16x16x8xf32>
    %c7 = arith.constant 7 : index
    %c0_53 = arith.constant 0 : index
    %c0_54 = arith.constant 0 : index
    %c0_55 = arith.constant 0 : index
    %52 = vector.load %arg2[%c7, %c0_53, %c0_54, %c0_55] : memref<9x1x1x8xf32, #tpu.memory_space<vmem>>, vector<1x1x1x8xf32>
    %53 = vector.shape_cast %52 : vector<1x1x1x8xf32> to vector<1x1x8xf32>
    %54 = vector.broadcast %53 : vector<1x1x8xf32> to vector<16x16x8xf32>
    %55 = arith.mulf %51, %54 : vector<16x16x8xf32>
    %56 = arith.addf %49, %55 : vector<16x16x8xf32>
    %c0_56 = arith.constant 0 : index
    %c2_57 = arith.constant 2 : index
    %c2_58 = arith.constant 2 : index
    %c0_59 = arith.constant 0 : index
    %57 = vector.load %arg1[%c0_56, %c2_57, %c2_58, %c0_59] : memref<1x18x18x8xf32, #tpu.memory_space<vmem>>, vector<1x16x16x8xf32>
    %58 = vector.shape_cast %57 : vector<1x16x16x8xf32> to vector<16x16x8xf32>
    %c8 = arith.constant 8 : index
    %c0_60 = arith.constant 0 : index
    %c0_61 = arith.constant 0 : index
    %c0_62 = arith.constant 0 : index
    %59 = vector.load %arg2[%c8, %c0_60, %c0_61, %c0_62] : memref<9x1x1x8xf32, #tpu.memory_space<vmem>>, vector<1x1x1x8xf32>
    %60 = vector.shape_cast %59 : vector<1x1x1x8xf32> to vector<1x1x8xf32>
    %61 = vector.broadcast %60 : vector<1x1x8xf32> to vector<16x16x8xf32>
    %62 = arith.mulf %58, %61 : vector<16x16x8xf32>
    %63 = arith.addf %56, %62 : vector<16x16x8xf32>
    %64 = arith.truncf %63 : vector<16x16x8xf32> to vector<16x16x8xbf16>
    %c0_63 = arith.constant 0 : index
    %c0_64 = arith.constant 0 : index
    %c0_65 = arith.constant 0 : index
    %c0_66 = arith.constant 0 : index
    %65 = vector.load %arg3[%c0_63, %c0_64, %c0_65, %c0_66] : memref<1x16x16x8xbf16, #tpu.memory_space<vmem>>, vector<1x16x16x8xbf16>
    %66 = vector.shape_cast %65 : vector<1x16x16x8xbf16> to vector<16x16x8xbf16>
    %67 = vector.shape_cast %64 : vector<16x16x8xbf16> to vector<1x16x16x8xbf16>
    tpu.vector_store %arg3[%c0_63, %c0_64, %c0_65, %c0_66], %67 {strides = array<i32>} : memref<1x16x16x8xbf16, #tpu.memory_space<vmem>>, vector<1x16x16x8xbf16>,
    return
  }
  func.func @transform_0(%arg0: i32) -> (i32, i32, i32, i32) {
    %c0_i32 = arith.constant 0 : i32
    %c0_i32_0 = arith.constant 0 : i32
    %c0_i32_1 = arith.constant 0 : i32
    %c0_i32_2 = arith.constant 0 : i32
    return %arg0, %c0_i32, %c0_i32_0, %c0_i32_1 : i32, i32, i32, i32
  }
  func.func @transform_1(%arg0: i32) -> (i32, i32, i32, i32) {
    %c0_i32 = arith.constant 0 : i32
    %c0_i32_0 = arith.constant 0 : i32
    %c0_i32_1 = arith.constant 0 : i32
    %c0_i32_2 = arith.constant 0 : i32
    %c0_i32_3 = arith.constant 0 : i32
    return %c0_i32, %c0_i32_0, %c0_i32_1, %c0_i32_2 : i32, i32, i32, i32
  }
  func.func @transform_2(%arg0: i32) -> (i32, i32, i32, i32) {
    %c0_i32 = arith.constant 0 : i32
    %c0_i32_0 = arith.constant 0 : i32
    %c0_i32_1 = arith.constant 0 : i32
    %c0_i32_2 = arith.constant 0 : i32
    return %arg0, %c0_i32, %c0_i32_0, %c0_i32_1 : i32, i32, i32, i32
  }
}

</mosaic_0001>

<bundles_post_ra>
// kernel: tpu_custom_call.1
= control target key start
LH: loop header
LB: loop body
LE: loop exit
PB: predicated region body
PF: predicated region fallthrough
CT: control target
= control target key end

     0   :  { %s1435_s9 = smov 0   ;;  %s2050_s0 = inlined_call_operand.vmem [shape: f32[2,18,18,8], index: 0, kind: input, shape index: {}]   ;;  %s2051_s1 = inlined_call_operand.vmem [shape: f32[9,1,1,8], index: 1, kind: input, shape index: {}]   ;;  %s2052_s2 = inlined_call_operand.vmem [shape: bf16[2,16,16,8], index: 2, kind: output, shape index: {}]  }
   0x1 LB: > { %s1174_s10 = sadd.s32 4294967295, %s1418_s9   ;;  %p1178_p0 = scmp.ge.s32.totalorder %s1418_s9, 1  ;;  %s1418_s9 = sphi %s1435_s9, %s12_s9  }
   0x2   : > { %p112_p1 = scmp.lt.s32.totalorder %s1418_s9, 3 }
   0x4   : > { %p113_p2 = pnand %p1178_p0, %p112_p1 }
   0x5   : > { %p134_p3 = scmp.lt.s32.totalorder (!%p113_p2), %s1174_s10, 1 }
   0x6   : > { %116 = sbr.rel (%p113_p2) target bundleno = 171 (0xab), region = 28 }
   0xb   : > { %s2054_s10 = smov (!%p134_p3, %s1174_s10), 1  ;;  %v1448_v0 = vld [vmem:[%s2051_s1] ss:$0 sm:$0xff]  ;;  %v1453_v1 = vld [vmem:[%s2051_s1 + $0x1] ss:$0 sm:$0xff]  ;;  %vm1086_vm0 = vcmask 60416  }
   0xc   : > { %v1458_v2 = vld [vmem:[%s2051_s1 + $0x2] ss:$0 sm:$0xff]  ;;  %v1463_v3 = vld [vmem:[%s2051_s1 + $0x3] ss:$0 sm:$0xff]  ;;  %s1385_s19 = smul.u32 432, %s2054_s10  ;;  %s1384_s5 = sshll.u32 %s2054_s10, 7 }
   0xd   : > { %v1469_v4 = vld [vmem:[%s2051_s1 + $0x4] ss:$0 sm:$0xff]  ;;  %v1474_v5 = vld [vmem:[%s2051_s1 + $0x5] ss:$0 sm:$0xff]  ;;  %v1484_v6 = vld [vmem:[%s2051_s1 + $0x6] ss:$0 sm:$0xff]  ;;  %s1585_s8 = scalar_lea.vmem %s2052_s2, %s1384_s5 }
   0xe   : > { %s1479_s26 = scalar_lea.vmem %s2050_s0, %s1385_s19  ;;  %v1489_v7 = vld [vmem:[%s2051_s1 + $0x7] ss:$0 sm:$0xff]  ;;  %v1502_v16 = vld [vmem:[%s2051_s1 + $0x8] ss:$0 sm:$0xff] }
   0xf   : > { %v144_v8 = vld [vmem:[%s1479_s26] sm:$0xff]  ;;  %v1184_v14 = vld [vmem:[%s1479_s26 + $0x18] sm:$0xff]  ;;  %v145_v22 = vld [vmem:[%s1479_s26 + $0x8] sm:$0xff] }
  0x10   : > { %v244_v9 = vld [vmem:[%s1479_s26 + $0x1] sm:$0xff]  ;;  %v180_v11 = vmul.f32 %v1448_v0, %v144_v8  ;;  %v1217_v15 = vld [vmem:[%s1479_s26 + $0x19] sm:$0xff]  ;;  %v484_v17 = vmul.f32 %v1463_v3, %v1184_v14  ;;  %v245_v23 = vld [vmem:[%s1479_s26 + $0x9] sm:$0xff]  ;;  %v182_v25 = vmul.f32 %v1448_v0, %v1184_v14  ;;  %v181_v29 = vmul.f32 %v1448_v0, %v145_v22 }
  0x11   : > { %v345_v10 = vld [vmem:[%s1479_s26 + $0x2] sm:$0xff]  ;;  %v281_v12 = vmul.f32 %v1453_v1, %v244_v9  ;;  %v1250_v18 = vld [vmem:[%s1479_s26 + $0x1a] sm:$0xff]  ;;  %v585_v20 = vmul.f32 %v1469_v4, %v1217_v15  ;;  %v346_v24 = vld [vmem:[%s1479_s26 + $0xa] sm:$0xff]  ;;  %v282_v30 = vmul.f32 %v1453_v1, %v245_v23  ;;  %v283_v32 = vmul.f32 %v1453_v1, %v1217_v15 }
  0x12   : > { %v382_v13 = vmul.f32 %v1458_v2, %v345_v10  ;;  %v686_v21 = vmul.f32 %v1474_v5, %v1250_v18  ;;  %v1283_v26 = vld [vmem:[%s1479_s26 + $0x30] sm:$0xff]  ;;  %v383_v31 = vmul.f32 %v1458_v2, %v346_v24  ;;  %v1185_v37 = vld [vmem:[%s1479_s26 + $0x20] sm:$0xff]  ;;  %v1284_v45 = vld [vmem:[%s1479_s26 + $0x38] sm:$0xff]  ;;  %v384_v49 = vmul.f32 %v1458_v2, %v1250_v18 }
  0x13   : > { %v313_v19 = vadd.f32 %v281_v12, %v180_v11  ;;  %v1316_v27 = vld [vmem:[%s1479_s26 + $0x31] sm:$0xff]  ;;  %v788_v34 = vmul.f32 %v1484_v6, %v1283_v26  ;;  %v1218_v38 = vld [vmem:[%s1479_s26 + $0x21] sm:$0xff]  ;;  %v314_v40 = vadd.f32 %v282_v30, %v181_v29  ;;  %v485_v41 = vmul.f32 %v1463_v3, %v1185_v37  ;;  %v1530_v46 = vld [vmem:[%s1479_s26 + $0x39] sm:$0xff] }
  0x14   : > { %v1349_v28 = vld [vmem:[%s1479_s26 + $0x32] sm:$0xff]  ;;  %v889_v35 = vmul.f32 %v1489_v7, %v1316_v27  ;;  %v1251_v39 = vld [vmem:[%s1479_s26 + $0x22] sm:$0xff]  ;;  %v586_v42 = vmul.f32 %v1469_v4, %v1218_v38  ;;  %v1533_v47 = vld [vmem:[%s1479_s26 + $0x3a] sm:$0xff]  ;;  %v315_v48 = vadd.f32 %v283_v32, %v182_v25  ;;  %v486_v50 = vmul.f32 %v1463_v3, %v1283_v26 }
  0x15   : > { %v414_v33 = vadd.f32 %v382_v13, %v313_v19  ;;  %v990_v36 = vmul.f32 %v1502_v16, %v1349_v28  ;;  %v687_v43 = vmul.f32 %v1474_v5, %v1251_v39  ;;  %v415_v51 = vadd.f32 %v383_v31, %v314_v40  ;;  %v1545_v60 = vld [vmem:[%s1479_s26 + $0x48] sm:$0xff]  ;;  %v1568_v25 = vld [vmem:[%s1479_s26 + $0x50] sm:$0xff] }
  0x16   : > { %v789_v52 = vmul.f32 %v1484_v6, %v1284_v45  ;;  %v890_v53 = vmul.f32 %v1489_v7, %v1530_v46  ;;  %v991_v54 = vmul.f32 %v1502_v16, %v1533_v47  ;;  %v416_v56 = vadd.f32 %v384_v49, %v315_v48  ;;  %v1548_v61 = vld [vmem:[%s1479_s26 + $0x49] sm:$0xff]  ;;  %v1352_v40 = vld [vmem:[%s1479_s26 + $0x52] sm:$0xff] }
  0x17   : > { %v516_v44 = vadd.f32 %v484_v17, %v414_v33  ;;  %v587_v57 = vmul.f32 %v1469_v4, %v1316_v27  ;;  %v688_v58 = vmul.f32 %v1474_v5, %v1349_v28  ;;  %v517_v59 = vadd.f32 %v485_v41, %v415_v51  ;;  %v1558_v13 = vld [vmem:[%s1479_s26 + $0x4a] sm:$0xff] }
  0x18   : > { %v183_v62 = vmul.f32 %v1448_v0, %v1185_v37  ;;  %v284_v63 = vmul.f32 %v1453_v1, %v1218_v38  ;;  %v385_v8 = vmul.f32 %v1458_v2, %v1251_v39  ;;  %v518_v10 = vadd.f32 %v486_v50, %v416_v56  ;;  %v1319_v39 = vld [vmem:[%s1479_s26 + $0x51] sm:$0xff] }
  0x19   : > { %v617_v55 = vadd.f32 %v585_v20, %v516_v44  ;;  %v790_v11 = vmul.f32 %v1484_v6, %v1545_v60  ;;  %v891_v12 = vmul.f32 %v1489_v7, %v1548_v61  ;;  %v618_v14 = vadd.f32 %v586_v42, %v517_v59 }
  0x1a   : > { %v992_v15 = vmul.f32 %v1502_v16, %v1558_v13  ;;  %v316_v17 = vadd.f32 %v284_v63, %v183_v62  ;;  %v487_v18 = vmul.f32 %v1463_v3, %v1284_v45  ;;  %v619_v20 = vadd.f32 %v587_v57, %v518_v10  ;;  %v1320_v10 = vld [vmem:[%s1479_s26 + $0x61] sm:$0xff] }
  0x1b   : > { %v718_v9 = vadd.f32 %v686_v21, %v617_v55  ;;  %v588_v21 = vmul.f32 %v1469_v4, %v1530_v46  ;;  %v689_v22 = vmul.f32 %v1474_v5, %v1533_v47  ;;  %v719_v23 = vadd.f32 %v687_v43, %v618_v14 }
  0x1c   : > { %v417_v24 = vadd.f32 %v385_v8, %v316_v17  ;;  %v184_v29 = vmul.f32 %v1448_v0, %v1283_v26  ;;  %v285_v30 = vmul.f32 %v1453_v1, %v1316_v27  ;;  %v720_v32 = vadd.f32 %v688_v58, %v619_v20  ;;  %v1287_v58 = vld [vmem:[%s1479_s26 + $0x60] sm:$0xff] }
  0x1d   : > { %v820_v19 = vadd.f32 %v788_v34, %v718_v9  ;;  %v791_v33 = vmul.f32 %v1484_v6, %v1568_v25  ;;  %v386_v34 = vmul.f32 %v1458_v2, %v1349_v28  ;;  %v821_v37 = vadd.f32 %v789_v52, %v719_v23  ;;  %v1353_v17 = vld [vmem:[%s1479_s26 + $0x62] sm:$0xff] }
  0x1e   : > { %v519_v38 = vadd.f32 %v487_v18, %v417_v24  ;;  %v317_v41 = vadd.f32 %v285_v30, %v184_v29  ;;  %v488_v42 = vmul.f32 %v1463_v3, %v1545_v60  ;;  %v822_v26 = vadd.f32 %v790_v11, %v720_v32 }
  0x1f   : > { %v921_v31 = vadd.f32 %v889_v35, %v820_v19  ;;  %v892_v27 = vmul.f32 %v1489_v7, %v1319_v39  ;;  %v993_v35 = vmul.f32 %v1502_v16, %v1352_v40  ;;  %v922_v28 = vadd.f32 %v890_v53, %v821_v37 }
  0x20   : > { %v620_v44 = vadd.f32 %v588_v21, %v519_v38  ;;  %v418_v48 = vadd.f32 %v386_v34, %v317_v41  ;;  %v589_v49 = vmul.f32 %v1469_v4, %v1548_v61  ;;  %v690_v51 = vmul.f32 %v1474_v5, %v1558_v13  ;;  %v1321_v41 = vld [vmem:[%s1479_s26 + $0x69] sm:$0xff] }
  0x21   : > { %v1022_v43 = vadd.f32 %v990_v36, %v921_v31  ;;  %v923_v36 = vadd.f32 %v891_v12, %v822_v26  ;;  %v185_v52 = vmul.f32 %v1448_v0, %v1284_v45  ;;  %v1023_v55 = vadd.f32 %v991_v54, %v922_v28  ;;  %v1288_v31 = vld [vmem:[%s1479_s26 + $0x68] sm:$0xff] }
  0x22   : > { %v721_v56 = vadd.f32 %v689_v22, %v620_v44  ;;  %v520_v57 = vadd.f32 %v488_v42, %v418_v48  ;;  %v286_v53 = vmul.f32 %v1453_v1, %v1530_v46  ;;  %v792_v62 = vmul.f32 %v1484_v6, %v1287_v58 }
  0x23   : > { %v1054_v50 = vpack.c.bf16 %v1022_v43, %v1022_v43  ;;  %v1024_v59 = vadd.f32 %v992_v15, %v923_v36  ;;  %v387_v63 = vmul.f32 %v1458_v2, %v1533_v47  ;;  %v489_v45 = vmul.f32 %v1463_v3, %v1568_v25  ;;  %v1289_v36 = vld [vmem:[%s1479_s26 + $0x78] sm:$0xff] }
  0x24   : > { %v1055_v54 = vpack.c.bf16 %v1023_v55, %v1023_v55  ;;  %v823_v8 = vadd.f32 %v791_v33, %v721_v56  ;;  %v621_v9 = vadd.f32 %v589_v49, %v520_v57  ;;  %v318_v11 = vadd.f32 %v286_v53, %v185_v52  ;;  %v1322_v57 = vld [vmem:[%s1479_s26 + $0x79] sm:$0xff] }
  0x25   : > { %1087 = vst.msk [vmem:[%s1585_s8] sm:$0xf] %vm1086_vm0, %v1054_v50  ;;  %v1056_v12 = vpack.c.bf16 %v1024_v59, %v1024_v59  ;;  %v893_v46 = vmul.f32 %v1489_v7, %v1320_v10  ;;  %v590_v47 = vmul.f32 %v1469_v4, %v1319_v39  ;;  %v994_v19 = vmul.f32 %v1502_v16, %v1353_v17 }
  0x26   : > { %1088 = vst.msk [vmem:[%s1585_s8 + $0x4] sm:$0xf] %vm1086_vm0, %v1055_v54  ;;  %v924_v14 = vadd.f32 %v892_v27, %v823_v8  ;;  %v722_v15 = vadd.f32 %v690_v51, %v621_v9  ;;  %v419_v18 = vadd.f32 %v387_v63, %v318_v11  ;;  %v186_v20 = vmul.f32 %v1448_v0, %v1545_v60  ;;  %v1355_v11 = vld [vmem:[%s1479_s26 + $0x7a] sm:$0xff] }
  0x27   : > { %1089 = vst.msk [vmem:[%s1585_s8 + $0x8] sm:$0xf] %vm1086_vm0, %v1056_v12  ;;  %v287_v21 = vmul.f32 %v1453_v1, %v1548_v61  ;;  %v388_v22 = vmul.f32 %v1458_v2, %v1558_v13  ;;  %v691_v30 = vmul.f32 %v1474_v5, %v1352_v40  ;;  %v793_v32 = vmul.f32 %v1484_v6, %v1288_v31  ;;  %v1354_v13 = vld [vmem:[%s1479_s26 + $0x6a] sm:$0xff] }
  0x28   : > { %v1025_v23 = vadd.f32 %v993_v35, %v924_v14  ;;  %v824_v24 = vadd.f32 %v792_v62, %v722_v15  ;;  %v521_v29 = vadd.f32 %v489_v45, %v419_v18  ;;  %v490_v34 = vmul.f32 %v1463_v3, %v1287_v58 }
  0x29   : > { %v319_v33 = vadd.f32 %v287_v21, %v186_v20  ;;  %v591_v61 = vmul.f32 %v1469_v4, %v1320_v10  ;;  %v187_v43 = vmul.f32 %v1448_v0, %v1568_v25  ;;  %v288_v26 = vmul.f32 %v1453_v1, %v1319_v39 }
  0x2a   : > { %v1057_v60 = vpack.c.bf16 %v1025_v23, %v1025_v23  ;;  %v925_v37 = vadd.f32 %v893_v46, %v824_v24  ;;  %v622_v38 = vadd.f32 %v590_v47, %v521_v29  ;;  %v389_v27 = vmul.f32 %v1458_v2, %v1352_v40  ;;  %v1290_v46 = vld [vmem:[%s1479_s26 + $0x80] sm:$0xff] }
  0x2b   : > { %v420_v42 = vadd.f32 %v388_v22, %v319_v33  ;;  %v894_v44 = vmul.f32 %v1489_v7, %v1321_v41  ;;  %v995_v48 = vmul.f32 %v1502_v16, %v1354_v13  ;;  %v692_v50 = vmul.f32 %v1474_v5, %v1353_v17 }
  0x2c   : > { %1090 = vst.msk [vmem:[%s1585_s8 + $0xc] sm:$0xf] %vm1086_vm0, %v1057_v60  ;;  %v1026_v35 = vadd.f32 %v994_v19, %v925_v37  ;;  %v723_v28 = vadd.f32 %v691_v30, %v622_v38  ;;  %v320_v51 = vadd.f32 %v288_v26, %v187_v43  ;;  %v491_v25 = vmul.f32 %v1463_v3, %v1288_v31  ;;  %v1291_v38 = vld [vmem:[%s1479_s26 + $0x90] sm:$0xff] }
  0x2d   : > { %v522_v49 = vadd.f32 %v490_v34, %v420_v42  ;;  %v794_v52 = vmul.f32 %v1484_v6, %v1289_v36  ;;  %v592_v55 = vmul.f32 %v1469_v4, %v1321_v41  ;;  %v188_v59 = vmul.f32 %v1448_v0, %v1287_v58  ;;  %v1356_v34 = vld [vmem:[%s1479_s26 + $0x82] sm:$0xff] }
  0x2e   : > { %v1058_v39 = vpack.c.bf16 %v1026_v35, %v1026_v35  ;;  %v825_v40 = vadd.f32 %v793_v32, %v723_v28  ;;  %v421_v53 = vadd.f32 %v389_v27, %v320_v51  ;;  %v289_v62 = vmul.f32 %v1453_v1, %v1320_v10  ;;  %v1324_v35 = vld [vmem:[%s1479_s26 + $0x91] sm:$0xff] }
  0x2f   : > { %v623_v56 = vadd.f32 %v591_v61, %v522_v49  ;;  %v895_v45 = vmul.f32 %v1489_v7, %v1322_v57  ;;  %v693_v54 = vmul.f32 %v1474_v5, %v1354_v13  ;;  %v390_v8 = vmul.f32 %v1458_v2, %v1353_v17  ;;  %v1323_v17 = vld [vmem:[%s1479_s26 + $0x81] sm:$0xff] }
  0x30   : > { %1091 = vst.msk [vmem:[%s1585_s8 + $0x10] sm:$0xf] %vm1086_vm0, %v1058_v39  ;;  %v926_v63 = vadd.f32 %v894_v44, %v825_v40  ;;  %v523_v12 = vadd.f32 %v491_v25, %v421_v53  ;;  %v321_v14 = vadd.f32 %v289_v62, %v188_v59  ;;  %v492_v15 = vmul.f32 %v1463_v3, %v1289_v36  ;;  %v1357_v40 = vld [vmem:[%s1479_s26 + $0x92] sm:$0xff] }
  0x31   : > { %v724_v9 = vadd.f32 %v692_v50, %v623_v56  ;;  %v996_v10 = vmul.f32 %v1502_v16, %v1355_v11  ;;  %v795_v18 = vmul.f32 %v1484_v6, %v1290_v46  ;;  %v593_v47 = vmul.f32 %v1469_v4, %v1322_v57  ;;  %v1292_v56 = vld [vmem:[%s1479_s26 + $0x98] sm:$0xff] }
  0x32   : > { %v1027_v58 = vadd.f32 %v995_v48, %v926_v63  ;;  %v624_v20 = vadd.f32 %v592_v55, %v523_v12  ;;  %v422_v21 = vadd.f32 %v390_v8, %v321_v14  ;;  %v189_v22 = vmul.f32 %v1448_v0, %v1288_v31  ;;  %v1325_v14 = vld [vmem:[%s1479_s26 + $0x99] sm:$0xff] }
  0x33   : > { %v826_v19 = vadd.f32 %v794_v52, %v724_v9  ;;  %v896_v24 = vmul.f32 %v1489_v7, %v1323_v17  ;;  %v290_v29 = vmul.f32 %v1453_v1, %v1321_v41  ;;  %v391_v30 = vmul.f32 %v1458_v2, %v1354_v13 }
  0x34   : > { %v1059_v23 = vpack.c.bf16 %v1027_v58, %v1027_v58  ;;  %v725_v33 = vadd.f32 %v693_v54, %v624_v20  ;;  %v524_v60 = vadd.f32 %v492_v15, %v422_v21  ;;  %v694_v37 = vmul.f32 %v1474_v5, %v1355_v11 }
  0x35   : > { %v927_v32 = vadd.f32 %v895_v45, %v826_v19  ;;  %v997_v61 = vmul.f32 %v1502_v16, %v1356_v34  ;;  %v796_v31 = vmul.f32 %v1484_v6, %v1291_v38  ;;  %v322_v42 = vadd.f32 %v290_v29, %v189_v22  ;;  %v1293_v22 = vld [vmem:[%s1479_s26 + $0xa8] sm:$0xff] }
  0x36   : > { %1092 = vst.msk [vmem:[%s1585_s8 + $0x14] sm:$0xf] %vm1086_vm0, %v1059_v23  ;;  %v493_v41 = vmul.f32 %v1463_v3, %v1290_v46  ;;  %v827_v13 = vadd.f32 %v795_v18, %v725_v33  ;;  %v625_v26 = vadd.f32 %v593_v47, %v524_v60  ;;  %v594_v27 = vmul.f32 %v1469_v4, %v1323_v17  ;;  %v1358_v47 = vld [vmem:[%s1479_s26 + $0x9a] sm:$0xff] }
  0x37   : > { %v1028_v43 = vadd.f32 %v996_v10, %v927_v32  ;;  %v423_v28 = vadd.f32 %v391_v30, %v322_v42  ;;  %v190_v44 = vmul.f32 %v1448_v0, %v1289_v36  ;;  %v291_v48 = vmul.f32 %v1453_v1, %v1322_v57 }
  0x38   : > { %v392_v49 = vmul.f32 %v1458_v2, %v1355_v11  ;;  %v928_v51 = vadd.f32 %v896_v24, %v827_v13  ;;  %v726_v25 = vadd.f32 %v694_v37, %v625_v26  ;;  %v897_v39 = vmul.f32 %v1489_v7, %v1324_v35  ;;  %v1359_v13 = vld [vmem:[%s1479_s26 + $0xaa] sm:$0xff] }
  0x39   : > { %v1060_v50 = vpack.c.bf16 %v1028_v43, %v1028_v43  ;;  %v525_v52 = vadd.f32 %v493_v41, %v423_v28  ;;  %v695_v55 = vmul.f32 %v1474_v5, %v1356_v34  ;;  %v323_v53 = vadd.f32 %v291_v48, %v190_v44  ;;  %v1294_v28 = vld [vmem:[%s1479_s26 + $0xb0] sm:$0xff] }
  0x3a   : > { %v494_v59 = vmul.f32 %v1463_v3, %v1291_v38  ;;  %v1029_v36 = vadd.f32 %v997_v61, %v928_v51  ;;  %v828_v57 = vadd.f32 %v796_v31, %v726_v25  ;;  %v998_v62 = vmul.f32 %v1502_v16, %v1357_v40 }
  0x3b   : > { %1093 = vst.msk [vmem:[%s1585_s8 + $0x18] sm:$0xf] %vm1086_vm0, %v1060_v50  ;;  %v797_v63 = vmul.f32 %v1484_v6, %v1292_v56  ;;  %v626_v45 = vadd.f32 %v594_v27, %v525_v52  ;;  %v424_v54 = vadd.f32 %v392_v49, %v323_v53  ;;  %v595_v8 = vmul.f32 %v1469_v4, %v1324_v35  ;;  %v1327_v53 = vld [vmem:[%s1479_s26 + $0xb1] sm:$0xff] }
  0x3c   : > { %v191_v9 = vmul.f32 %v1448_v0, %v1290_v46  ;;  %v1061_v11 = vpack.c.bf16 %v1029_v36, %v1029_v36  ;;  %v929_v12 = vadd.f32 %v897_v39, %v828_v57  ;;  %v292_v15 = vmul.f32 %v1453_v1, %v1323_v17 }
  0x3d   : > { %v393_v58 = vmul.f32 %v1458_v2, %v1356_v34  ;;  %v727_v10 = vadd.f32 %v695_v55, %v626_v45  ;;  %v898_v18 = vmul.f32 %v1489_v7, %v1325_v14  ;;  %v526_v19 = vadd.f32 %v494_v59, %v424_v54  ;;  %v1326_v34 = vld [vmem:[%s1479_s26 + $0xa9] sm:$0xff] }
  0x3e   : > { %v696_v20 = vmul.f32 %v1474_v5, %v1357_v40  ;;  %1094 = vst.msk [vmem:[%s1585_s8 + $0x1c] sm:$0xf] %vm1086_vm0, %v1061_v11  ;;  %v1030_v21 = vadd.f32 %v998_v62, %v929_v12  ;;  %v999_v46 = vmul.f32 %v1502_v16, %v1358_v47  ;;  %v324_v23 = vadd.f32 %v292_v15, %v191_v9  ;;  %v1295_v9 = vld [vmem:[%s1479_s26 + $0xc0] sm:$0xff] }
  0x3f   : > { %v495_v17 = vmul.f32 %v1463_v3, %v1292_v56  ;;  %v829_v24 = vadd.f32 %v797_v63, %v727_v10  ;;  %v627_v29 = vadd.f32 %v595_v8, %v526_v19  ;;  %v798_v30 = vmul.f32 %v1484_v6, %v1293_v22  ;;  %v1360_v63 = vld [vmem:[%s1479_s26 + $0xb2] sm:$0xff] }
  0x40   : > { %v596_v32 = vmul.f32 %v1469_v4, %v1325_v14  ;;  %v1062_v33 = vpack.c.bf16 %v1030_v21, %v1030_v21  ;;  %v425_v60 = vadd.f32 %v393_v58, %v324_v23  ;;  %v192_v37 = vmul.f32 %v1448_v0, %v1291_v38 }
  0x41   : > { %v293_v61 = vmul.f32 %v1453_v1, %v1324_v35  ;;  %v930_v31 = vadd.f32 %v898_v18, %v829_v24  ;;  %v728_v42 = vadd.f32 %v696_v20, %v627_v29  ;;  %v899_v41 = vmul.f32 %v1489_v7, %v1326_v34  ;;  %v1361_v29 = vld [vmem:[%s1479_s26 + $0xc2] sm:$0xff] }
  0x42   : > { %v394_v43 = vmul.f32 %v1458_v2, %v1357_v40  ;;  %1095 = vst.msk [vmem:[%s1585_s8 + $0x20] sm:$0xf] %vm1086_vm0, %v1062_v33  ;;  %v527_v26 = vadd.f32 %v495_v17, %v425_v60  ;;  %v697_v27 = vmul.f32 %v1474_v5, %v1358_v47  ;;  %v496_v48 = vmul.f32 %v1463_v3, %v1293_v22  ;;  %v1296_v33 = vld [vmem:[%s1479_s26 + $0xc8] sm:$0xff] }
  0x43   : > { %v325_v44 = vadd.f32 %v293_v61, %v192_v37  ;;  %v1031_v38 = vadd.f32 %v999_v46, %v930_v31  ;;  %v830_v35 = vadd.f32 %v798_v30, %v728_v42  ;;  %v1000_v49 = vmul.f32 %v1502_v16, %v1359_v13 }
  0x44   : > { %v799_v50 = vmul.f32 %v1484_v6, %v1294_v28  ;;  %v628_v51 = vadd.f32 %v596_v32, %v527_v26  ;;  %v597_v39 = vmul.f32 %v1469_v4, %v1326_v34  ;;  %v193_v40 = vmul.f32 %v1448_v0, %v1292_v56 }
  0x45   : > { %v426_v25 = vadd.f32 %v394_v43, %v325_v44  ;;  %v1063_v52 = vpack.c.bf16 %v1031_v38, %v1031_v38  ;;  %v931_v55 = vadd.f32 %v899_v41, %v830_v35  ;;  %v294_v59 = vmul.f32 %v1453_v1, %v1325_v14  ;;  %v1329_v44 = vld [vmem:[%s1479_s26 + $0xc9] sm:$0xff] }
  0x46   : > { %v395_v36 = vmul.f32 %v1458_v2, %v1358_v47  ;;  %v729_v57 = vadd.f32 %v697_v27, %v628_v51  ;;  %v900_v62 = vmul.f32 %v1489_v7, %v1327_v53  ;;  %v698_v54 = vmul.f32 %v1474_v5, %v1359_v13  ;;  %v1328_v47 = vld [vmem:[%s1479_s26 + $0xc1] sm:$0xff] }
  0x47   : > { %v528_v45 = vadd.f32 %v496_v48, %v426_v25  ;;  %1096 = vst.msk [vmem:[%s1585_s8 + $0x24] sm:$0xf] %vm1086_vm0, %v1063_v52  ;;  %v1032_v8 = vadd.f32 %v1000_v49, %v931_v55  ;;  %v1001_v56 = vmul.f32 %v1502_v16, %v1360_v63  ;;  %v326_v11 = vadd.f32 %v294_v59, %v193_v40  ;;  %v1297_v40 = vld [vmem:[%s1479_s26 + $0xd8] sm:$0xff] }
  0x48   : > { %v497_v12 = vmul.f32 %v1463_v3, %v1294_v28  ;;  %v831_v14 = vadd.f32 %v799_v50, %v729_v57  ;;  %v800_v58 = vmul.f32 %v1484_v6, %v1295_v9  ;;  %v598_v10 = vmul.f32 %v1469_v4, %v1327_v53  ;;  %v1362_v50 = vld [vmem:[%s1479_s26 + $0xca] sm:$0xff] }
  0x49   : > { %v629_v15 = vadd.f32 %v597_v39, %v528_v45  ;;  %v1064_v18 = vpack.c.bf16 %v1032_v8, %v1032_v8  ;;  %v427_v19 = vadd.f32 %v395_v36, %v326_v11  ;;  %v194_v20 = vmul.f32 %v1448_v0, %v1293_v22 }
  0x4a   : > { %v295_v21 = vmul.f32 %v1453_v1, %v1326_v34  ;;  %v932_v46 = vadd.f32 %v900_v62, %v831_v14  ;;  %v901_v17 = vmul.f32 %v1489_v7, %v1328_v47  ;;  %v396_v24 = vmul.f32 %v1458_v2, %v1359_v13 }
  0x4b   : > { %v730_v23 = vadd.f32 %v698_v54, %v629_v15  ;;  %1097 = vst.msk [vmem:[%s1585_s8 + $0x28] sm:$0xf] %vm1086_vm0, %v1064_v18  ;;  %v529_v30 = vadd.f32 %v497_v12, %v427_v19  ;;  %v699_v32 = vmul.f32 %v1474_v5, %v1360_v63  ;;  %v498_v37 = vmul.f32 %v1463_v3, %v1295_v9  ;;  %v1363_v15 = vld [vmem:[%s1479_s26 + $0xda] sm:$0xff] }
  0x4c   : > { %v327_v60 = vadd.f32 %v295_v21, %v194_v20  ;;  %v1033_v22 = vadd.f32 %v1001_v56, %v932_v46  ;;  %v1002_v61 = vmul.f32 %v1502_v16, %v1361_v29  ;;  %v801_v31 = vmul.f32 %v1484_v6, %v1296_v33  ;;  %v1298_v18 = vld [vmem:[%s1479_s26 + $0xe0] sm:$0xff] }
  0x4d   : > { %v832_v34 = vadd.f32 %v800_v58, %v730_v23  ;;  %v630_v42 = vadd.f32 %v598_v10, %v529_v30  ;;  %v599_v43 = vmul.f32 %v1469_v4, %v1328_v47  ;;  %v195_v13 = vmul.f32 %v1448_v0, %v1294_v28 }
  0x4e   : > { %v428_v41 = vadd.f32 %v396_v24, %v327_v60  ;;  %v1065_v26 = vpack.c.bf16 %v1033_v22, %v1033_v22  ;;  %v296_v48 = vmul.f32 %v1453_v1, %v1327_v53  ;;  %v397_v38 = vmul.f32 %v1458_v2, %v1360_v63  ;;  %v1330_v63 = vld [vmem:[%s1479_s26 + $0xd9] sm:$0xff]  ;;  %v1331_v60 = vld [vmem:[%s1479_s26 + $0xe1] sm:$0xff] }
  0x4f   : > { %v933_v27 = vadd.f32 %v901_v17, %v832_v34  ;;  %v731_v35 = vadd.f32 %v699_v32, %v630_v42  ;;  %v902_v49 = vmul.f32 %v1489_v7, %v1329_v44  ;;  %v700_v25 = vmul.f32 %v1474_v5, %v1361_v29 }
  0x50   : > { %v530_v51 = vadd.f32 %v498_v37, %v428_v41  ;;  %1098 = vst.msk [vmem:[%s1585_s8 + $0x2c] sm:$0xf] %vm1086_vm0, %v1065_v26  ;;  %v1003_v28 = vmul.f32 %v1502_v16, %v1362_v50  ;;  %v328_v52 = vadd.f32 %v296_v48, %v195_v13  ;;  %v499_v55 = vmul.f32 %v1463_v3, %v1296_v33  ;;  %v1299_v13 = vld [vmem:[%s1479_s26 + $0xf0] sm:$0xff] }
  0x51   : > { %v1034_v39 = vadd.f32 %v1002_v61, %v933_v27  ;;  %v833_v53 = vadd.f32 %v801_v31, %v731_v35  ;;  %v802_v36 = vmul.f32 %v1484_v6, %v1297_v40  ;;  %v600_v57 = vmul.f32 %v1469_v4, %v1329_v44  ;;  %v1364_v31 = vld [vmem:[%s1479_s26 + $0xe2] sm:$0xff] }
  0x52   : > { %v631_v59 = vadd.f32 %v599_v43, %v530_v51  ;;  %v429_v45 = vadd.f32 %v397_v38, %v328_v52  ;;  %v196_v54 = vmul.f32 %v1448_v0, %v1295_v9  ;;  %v297_v8 = vmul.f32 %v1453_v1, %v1328_v47 }
  0x53   : > { %v1066_v62 = vpack.c.bf16 %v1034_v39, %v1034_v39  ;;  %v934_v56 = vadd.f32 %v902_v49, %v833_v53  ;;  %v903_v12 = vmul.f32 %v1489_v7, %v1330_v63  ;;  %v398_v14 = vmul.f32 %v1458_v2, %v1361_v29 }
  0x54   : > { %v732_v11 = vadd.f32 %v700_v25, %v631_v59  ;;  %v531_v58 = vadd.f32 %v499_v55, %v429_v45  ;;  %v701_v10 = vmul.f32 %v1474_v5, %v1362_v50  ;;  %v329_v19 = vadd.f32 %v297_v8, %v196_v54  ;;  %v1365_v59 = vld [vmem:[%s1479_s26 + $0xf2] sm:$0xff] }
  0x55   : > { %1099 = vst.msk [vmem:[%s1585_s8 + $0x30] sm:$0xf] %vm1086_vm0, %v1066_v62  ;;  %v500_v20 = vmul.f32 %v1463_v3, %v1297_v40  ;;  %v1035_v9 = vadd.f32 %v1003_v28, %v934_v56  ;;  %v1004_v21 = vmul.f32 %v1502_v16, %v1363_v15  ;;  %v803_v46 = vmul.f32 %v1484_v6, %v1298_v18  ;;  %v1300_v62 = vld [vmem:[%s1479_s26 + $0xf8] sm:$0xff] }
  0x56   : > { %v834_v47 = vadd.f32 %v802_v36, %v732_v11  ;;  %v632_v23 = vadd.f32 %v600_v57, %v531_v58  ;;  %v430_v17 = vadd.f32 %v398_v14, %v329_v19  ;;  %v601_v24 = vmul.f32 %v1469_v4, %v1330_v63  ;;  %v1333_v19 = vld [vmem:[%s1479_s26 + $0xf9] sm:$0xff] }
  0x57   : > { %v197_v29 = vmul.f32 %v1448_v0, %v1296_v33  ;;  %v1067_v30 = vpack.c.bf16 %v1035_v9, %v1035_v9  ;;  %v298_v37 = vmul.f32 %v1453_v1, %v1329_v44  ;;  %v399_v22 = vmul.f32 %v1458_v2, %v1362_v50  ;;  %v1332_v50 = vld [vmem:[%s1479_s26 + $0xf1] sm:$0xff] }
  0x58   : > { %v935_v32 = vadd.f32 %v903_v12, %v834_v47  ;;  %v733_v34 = vadd.f32 %v701_v10, %v632_v23  ;;  %v904_v61 = vmul.f32 %v1489_v7, %v1331_v60  ;;  %v532_v42 = vadd.f32 %v500_v20, %v430_v17 }
  0x59   : > { %v702_v41 = vmul.f32 %v1474_v5, %v1363_v15  ;;  %1100 = vst.msk [vmem:[%s1585_s8 + $0x34] sm:$0xf] %vm1086_vm0, %v1067_v30  ;;  %v1005_v33 = vmul.f32 %v1502_v16, %v1364_v31  ;;  %v330_v26 = vadd.f32 %v298_v37, %v197_v29  ;;  %v501_v27 = vmul.f32 %v1463_v3, %v1298_v18  ;;  %v1301_v29 = vld [vmem:[%s1479_s26 + $0x108] sm:$0xff] }
  0x5a   : > { %v1036_v43 = vadd.f32 %v1004_v21, %v935_v32  ;;  %v835_v44 = vadd.f32 %v803_v46, %v733_v34  ;;  %v633_v48 = vadd.f32 %v601_v24, %v532_v42  ;;  %v804_v38 = vmul.f32 %v1484_v6, %v1299_v13  ;;  %v1366_v46 = vld [vmem:[%s1479_s26 + $0xfa] sm:$0xff] }
  0x5b   : > { %v602_v35 = vmul.f32 %v1469_v4, %v1331_v60  ;;  %v431_v51 = vadd.f32 %v399_v22, %v330_v26  ;;  %v198_v25 = vmul.f32 %v1448_v0, %v1297_v40  ;;  %v299_v39 = vmul.f32 %v1453_v1, %v1330_v63 }
  0x5c   : > { %v1068_v49 = vpack.c.bf16 %v1036_v43, %v1036_v43  ;;  %v936_v28 = vadd.f32 %v904_v61, %v835_v44  ;;  %v734_v52 = vadd.f32 %v702_v41, %v633_v48  ;;  %v905_v55 = vmul.f32 %v1489_v7, %v1332_v50  ;;  %v1367_v48 = vld [vmem:[%s1479_s26 + $0x10a] sm:$0xff] }
  0x5d   : > { %v400_v53 = vmul.f32 %v1458_v2, %v1363_v15  ;;  %v533_v36 = vadd.f32 %v501_v27, %v431_v51  ;;  %v703_v57 = vmul.f32 %v1474_v5, %v1364_v31  ;;  %v331_v45 = vadd.f32 %v299_v39, %v198_v25 }
  0x5e   : > { %1101 = vst.msk [vmem:[%s1585_s8 + $0x38] sm:$0xf] %vm1086_vm0, %v1068_v49  ;;  %v502_v54 = vmul.f32 %v1463_v3, %v1299_v13  ;;  %v1037_v40 = vadd.f32 %v1005_v33, %v936_v28  ;;  %v836_v63 = vadd.f32 %v804_v38, %v734_v52  ;;  %v1006_v8 = vmul.f32 %v1502_v16, %v1365_v59  ;;  %v1302_v49 = vld [vmem:[%s1479_s26 + $0x110] sm:$0xff] }
  0x5f   : > { %v805_v56 = vmul.f32 %v1484_v6, %v1300_v62  ;;  %v634_v11 = vadd.f32 %v602_v35, %v533_v36  ;;  %v432_v12 = vadd.f32 %v400_v53, %v331_v45  ;;  %v603_v14 = vmul.f32 %v1469_v4, %v1332_v50  ;;  %v1335_v45 = vld [vmem:[%s1479_s26 + $0x111] sm:$0xff] }
  0x60   : > { %v199_v15 = vmul.f32 %v1448_v0, %v1298_v18  ;;  %v1069_v58 = vpack.c.bf16 %v1037_v40, %v1037_v40  ;;  %v937_v10 = vadd.f32 %v905_v55, %v836_v63  ;;  %v300_v20 = vmul.f32 %v1453_v1, %v1331_v60 }
  0x61   : > { %v401_v9 = vmul.f32 %v1458_v2, %v1364_v31  ;;  %v735_v47 = vadd.f32 %v703_v57, %v634_v11  ;;  %v906_v21 = vmul.f32 %v1489_v7, %v1333_v19  ;;  %v534_v23 = vadd.f32 %v502_v54, %v432_v12  ;;  %v1334_v31 = vld [vmem:[%s1479_s26 + $0x109] sm:$0xff] }
  0x62   : > { %v704_v17 = vmul.f32 %v1474_v5, %v1365_v59  ;;  %1102 = vst.msk [vmem:[%s1585_s8 + $0x3c] sm:$0xf] %vm1086_vm0, %v1069_v58  ;;  %v1038_v24 = vadd.f32 %v1006_v8, %v937_v10  ;;  %v1007_v18 = vmul.f32 %v1502_v16, %v1366_v46  ;;  %v332_v30 = vadd.f32 %v300_v20, %v199_v15  ;;  %v1303_v15 = vld [vmem:[%s1479_s26 + $0x120] sm:$0xff] }
  0x63   : > { %v503_v32 = vmul.f32 %v1463_v3, %v1300_v62  ;;  %v837_v60 = vadd.f32 %v805_v56, %v735_v47  ;;  %v635_v37 = vadd.f32 %v603_v14, %v534_v23  ;;  %v806_v22 = vmul.f32 %v1484_v6, %v1301_v29  ;;  %v1368_v56 = vld [vmem:[%s1479_s26 + $0x112] sm:$0xff] }
  0x64   : > { %v604_v34 = vmul.f32 %v1469_v4, %v1333_v19  ;;  %v1070_v61 = vpack.c.bf16 %v1038_v24, %v1038_v24  ;;  %v433_v42 = vadd.f32 %v401_v9, %v332_v30  ;;  %v200_v41 = vmul.f32 %v1448_v0, %v1299_v13 }
  0x65   : > { %v301_v43 = vmul.f32 %v1453_v1, %v1332_v50  ;;  %v938_v33 = vadd.f32 %v906_v21, %v837_v60  ;;  %v736_v26 = vadd.f32 %v704_v17, %v635_v37  ;;  %v907_v27 = vmul.f32 %v1489_v7, %v1334_v31  ;;  %v1369_v37 = vld [vmem:[%s1479_s26 + $0x122] sm:$0xff] }
  0x66   : > { %v402_v44 = vmul.f32 %v1458_v2, %v1365_v59  ;;  %1103 = vst.msk [vmem:[%s1585_s8 + $0x40] sm:$0xf] %vm1086_vm0, %v1070_v61  ;;  %v535_v38 = vadd.f32 %v503_v32, %v433_v42  ;;  %v705_v35 = vmul.f32 %v1474_v5, %v1366_v46  ;;  %v504_v25 = vmul.f32 %v1463_v3, %v1301_v29  ;;  %v1843_v61 = vld [vmem:[%s1479_s26 + $0x128] sm:$0xff] }
  0x67   : > { %v333_v51 = vadd.f32 %v301_v43, %v200_v41  ;;  %v1039_v13 = vadd.f32 %v1007_v18, %v938_v33  ;;  %v838_v50 = vadd.f32 %v806_v22, %v736_v26  ;;  %v1008_v39 = vmul.f32 %v1502_v16, %v1367_v48 }
  0x68   : > { %v807_v28 = vmul.f32 %v1484_v6, %v1302_v49  ;;  %v636_v52 = vadd.f32 %v604_v34, %v535_v38  ;;  %v605_v53 = vmul.f32 %v1469_v4, %v1334_v31  ;;  %v201_v59 = vmul.f32 %v1448_v0, %v1300_v62 }
  0x69   : > { %v434_v55 = vadd.f32 %v402_v44, %v333_v51  ;;  %v1071_v36 = vpack.c.bf16 %v1039_v13, %v1039_v13  ;;  %v939_v57 = vadd.f32 %v907_v27, %v838_v50  ;;  %v302_v54 = vmul.f32 %v1453_v1, %v1333_v19  ;;  %v1337_v51 = vld [vmem:[%s1479_s26 + $0x129] sm:$0xff] }
  0x6a   : > { %v403_v40 = vmul.f32 %v1458_v2, %v1366_v46  ;;  %v737_v63 = vadd.f32 %v705_v35, %v636_v52  ;;  %v908_v8 = vmul.f32 %v1489_v7, %v1335_v45  ;;  %v706_v12 = vmul.f32 %v1474_v5, %v1367_v48  ;;  %v1336_v46 = vld [vmem:[%s1479_s26 + $0x121] sm:$0xff] }
  0x6b   : > { %v536_v11 = vadd.f32 %v504_v25, %v434_v55  ;;  %1104 = vst.msk [vmem:[%s1585_s8 + $0x44] sm:$0xf] %vm1086_vm0, %v1071_v36  ;;  %v1040_v14 = vadd.f32 %v1008_v39, %v939_v57  ;;  %v1009_v62 = vmul.f32 %v1502_v16, %v1368_v56  ;;  %v334_v58 = vadd.f32 %v302_v54, %v201_v59  ;;  %v1370_v39 = vld [vmem:[%s1479_s26 + $0x12a] sm:$0xff]  ;;  %v1338_v57 = vld [vmem:[%s1479_s26 + $0x139] sm:$0xff] }
  0x6c   : > { %v505_v10 = vmul.f32 %v1463_v3, %v1302_v49  ;;  %v839_v19 = vadd.f32 %v807_v28, %v737_v63  ;;  %v808_v9 = vmul.f32 %v1484_v6, %v1303_v15  ;;  %v606_v47 = vmul.f32 %v1469_v4, %v1335_v45  ;;  %v1887_v54 = vld [vmem:[%s2051_s1] ss:$0 sm:$0xff]  ;;  %v1893_v63 = vld [vmem:[%s2051_s1 + $0x1] ss:$0 sm:$0xff] }
  0x6d   : > { %v637_v20 = vadd.f32 %v605_v53, %v536_v11  ;;  %v1072_v21 = vpack.c.bf16 %v1040_v14, %v1040_v14  ;;  %v435_v23 = vadd.f32 %v403_v40, %v334_v58  ;;  %v202_v17 = vmul.f32 %v1448_v0, %v1301_v29  ;;  %v1880_v53 = vld [vmem:[%s2051_s1 + $0x4] ss:$0 sm:$0xff]  ;;  %v1371_v58 = vld [vmem:[%s1479_s26 + $0x13a] sm:$0xff] }
  0x6e   : > { %v303_v24 = vmul.f32 %v1453_v1, %v1334_v31  ;;  %v940_v18 = vadd.f32 %v908_v8, %v839_v19  ;;  %v909_v32 = vmul.f32 %v1489_v7, %v1336_v46  ;;  %v404_v60 = vmul.f32 %v1458_v2, %v1367_v48  ;;  %v1914_v19 = vld [vmem:[%s2051_s1 + $0x5] ss:$0 sm:$0xff] }
  0x6f   : > { %v738_v30 = vadd.f32 %v706_v12, %v637_v20  ;;  %1105 = vst.msk [vmem:[%s1585_s8 + $0x48] sm:$0xf] %vm1086_vm0, %v1072_v21  ;;  %v537_v22 = vadd.f32 %v505_v10, %v435_v23  ;;  %v707_v34 = vmul.f32 %v1474_v5, %v1368_v56  ;;  %v506_v29 = vmul.f32 %v1463_v3, %v1303_v15  ;;  %v1899_v12 = vld [vmem:[%s2051_s1 + $0x7] ss:$0 sm:$0xff] }
  0x70   : > { %v335_v42 = vadd.f32 %v303_v24, %v202_v17  ;;  %v1041_v31 = vadd.f32 %v1009_v62, %v940_v18  ;;  %v1010_v43 = vmul.f32 %v1502_v16, %v1369_v37  ;;  %v809_v33 = vmul.f32 %v1484_v6, %v1843_v61  ;;  %v1905_v62 = vld [vmem:[%s2051_s1 + $0x2] ss:$0 sm:$0xff]  ;;  %v1923_v17 = vld [vmem:[%s2051_s1 + $0x8] ss:$0 sm:$0xff] }
  0x71   : > { %v840_v41 = vadd.f32 %v808_v9, %v738_v30  ;;  %v638_v26 = vadd.f32 %v606_v47, %v537_v22  ;;  %v607_v44 = vmul.f32 %v1469_v4, %v1336_v46  ;;  %v203_v48 = vmul.f32 %v1448_v0, %v1302_v49  ;;  %v1861_v49 = vld [vmem:[%s1479_s26 + $0x138] sm:$0xff]  ;;  %v1306_v9 = vld [vmem:[%s1479_s26 + $0x140] sm:$0xff] }
  0x72   : > { %v436_v27 = vadd.f32 %v404_v60, %v335_v42  ;;  %v1073_v38 = vpack.c.bf16 %v1041_v31, %v1041_v31  ;;  %v304_v3 = vmul.f32 %v1453_v1, %v1335_v45  ;;  %v405_v25 = vmul.f32 %v1458_v2, %v1368_v56  ;;  %v1866_v1 = vld [vmem:[%s2051_s1 + $0x3] ss:$0 sm:$0xff] }
  0x73   : > { %v941_v35 = vadd.f32 %v909_v32, %v840_v41  ;;  %v739_v13 = vadd.f32 %v707_v34, %v638_v26  ;;  %v910_v50 = vmul.f32 %v1489_v7, %v1337_v51  ;;  %v708_v6 = vmul.f32 %v1474_v5, %v1369_v37  ;;  %v1873_v5 = vld [vmem:[%s2051_s1 + $0x6] ss:$0 sm:$0xff] }
  0x74   : > { %v538_v28 = vadd.f32 %v506_v29, %v436_v27  ;;  %1106 = vst.msk [vmem:[%s1585_s8 + $0x4c] sm:$0xf] %vm1086_vm0, %v1073_v38  ;;  %v1011_v0 = vmul.f32 %v1502_v16, %v1370_v39  ;;  %v336_v52 = vadd.f32 %v304_v3, %v203_v48  ;;  %v507_v2 = vmul.f32 %v1866_v1, %v1843_v61  ;;  %v1339_v42 = vld [vmem:[%s1479_s26 + $0x141] sm:$0xff]  ;;  %v1307_v48 = vld [vmem:[%s1479_s26 + $0x150] sm:$0xff] }
  0x75   : > { %v1042_v4 = vadd.f32 %v1010_v43, %v941_v35  ;;  %v841_v7 = vadd.f32 %v809_v33, %v739_v13  ;;  %v810_v16 = vmul.f32 %v1873_v5, %v1861_v49  ;;  %v608_v59 = vmul.f32 %v1880_v53, %v1337_v51  ;;  %v1372_v33 = vld [vmem:[%s1479_s26 + $0x142] sm:$0xff] }
  0x76   : > { %v639_v55 = vadd.f32 %v607_v44, %v538_v28  ;;  %v437_v45 = vadd.f32 %v405_v25, %v336_v52  ;;  %v204_v40 = vmul.f32 %v1887_v54, %v1303_v15  ;;  %v305_v8 = vmul.f32 %v1893_v63, %v1336_v46 }
  0x77   : > { %v1074_v36 = vpack.c.bf16 %v1042_v4, %v1042_v4  ;;  %v942_v56 = vadd.f32 %v910_v50, %v841_v7  ;;  %v911_v14 = vmul.f32 %v1899_v12, %v1338_v57  ;;  %v406_v15 = vmul.f32 %v1905_v62, %v1369_v37 }
  0x78   : > { %v740_v11 = vadd.f32 %v708_v6, %v639_v55  ;;  %v539_v10 = vadd.f32 %v507_v2, %v437_v45  ;;  %v709_v20 = vmul.f32 %v1914_v19, %v1370_v39  ;;  %v337_v47 = vadd.f32 %v305_v8, %v204_v40  ;;  %v1373_v55 = vld [vmem:[%s1479_s26 + $0x152] sm:$0xff] }
  0x79   : > { %1107 = vst.msk [vmem:[%s1585_s8 + $0x50] sm:$0xf] %vm1086_vm0, %v1074_v36  ;;  %v508_v21 = vmul.f32 %v1866_v1, %v1861_v49  ;;  %v1043_v46 = vadd.f32 %v1011_v0, %v942_v56  ;;  %v1012_v24 = vmul.f32 %v1923_v17, %v1371_v58  ;;  %v811_v18 = vmul.f32 %v1873_v5, %v1306_v9  ;;  %v1308_v36 = vld [vmem:[%s1479_s26 + $0x158] sm:$0xff] }
  0x7a   : > { %v842_v23 = vadd.f32 %v810_v16, %v740_v11  ;;  %v640_v30 = vadd.f32 %v608_v59, %v539_v10  ;;  %v438_v32 = vadd.f32 %v406_v15, %v337_v47  ;;  %v609_v60 = vmul.f32 %v1880_v53, %v1338_v57  ;;  %v1341_v47 = vld [vmem:[%s1479_s26 + $0x159] sm:$0xff] }
  0x7b   : > { %v205_v37 = vmul.f32 %v1887_v54, %v1843_v61  ;;  %v1075_v22 = vpack.c.bf16 %v1043_v46, %v1043_v46  ;;  %v306_v29 = vmul.f32 %v1893_v63, %v1337_v51  ;;  %v407_v31 = vmul.f32 %v1905_v62, %v1370_v39  ;;  %v1340_v39 = vld [vmem:[%s1479_s26 + $0x151] sm:$0xff] }
  0x7c   : > { %v943_v34 = vadd.f32 %v911_v14, %v842_v23  ;;  %v741_v41 = vadd.f32 %v709_v20, %v640_v30  ;;  %v912_v43 = vmul.f32 %v1899_v12, %v1339_v42  ;;  %v540_v26 = vadd.f32 %v508_v21, %v438_v32 }
  0x7d   : > { %v710_v27 = vmul.f32 %v1914_v19, %v1371_v58  ;;  %1108 = vst.msk [vmem:[%s1585_s8 + $0x54] sm:$0xf] %vm1086_vm0, %v1075_v22  ;;  %v1013_v61 = vmul.f32 %v1923_v17, %v1372_v33  ;;  %v338_v38 = vadd.f32 %v306_v29, %v205_v37  ;;  %v509_v35 = vmul.f32 %v1866_v1, %v1306_v9  ;;  %v1309_v37 = vld [vmem:[%s1479_s26 + $0x168] sm:$0xff] }
  0x7e   : > { %v1044_v44 = vadd.f32 %v1012_v24, %v943_v34  ;;  %v843_v51 = vadd.f32 %v811_v18, %v741_v41  ;;  %v641_v3 = vadd.f32 %v609_v60, %v540_v26  ;;  %v812_v25 = vmul.f32 %v1873_v5, %v1307_v48  ;;  %v1374_v18 = vld [vmem:[%s1479_s26 + $0x15a] sm:$0xff] }
  0x7f   : > { %v610_v13 = vmul.f32 %v1880_v53, %v1339_v42  ;;  %v439_v28 = vadd.f32 %v407_v31, %v338_v38  ;;  %v206_v6 = vmul.f32 %v1887_v54, %v1861_v49  ;;  %v307_v4 = vmul.f32 %v1893_v63, %v1338_v57 }
  0x80   : > { %v1076_v50 = vpack.c.bf16 %v1044_v44, %v1044_v44  ;;  %v944_v0 = vadd.f32 %v912_v43, %v843_v51  ;;  %v742_v52 = vadd.f32 %v710_v27, %v641_v3  ;;  %v913_v2 = vmul.f32 %v1899_v12, %v1340_v39  ;;  %v1375_v3 = vld [vmem:[%s1479_s26 + $0x16a] sm:$0xff] }
  0x81   : > { %v408_v7 = vmul.f32 %v1905_v62, %v1371_v58  ;;  %v541_v16 = vadd.f32 %v509_v35, %v439_v28  ;;  %v711_v59 = vmul.f32 %v1914_v19, %v1372_v33  ;;  %v339_v45 = vadd.f32 %v307_v4, %v206_v6 }
  0x82   : > { %1109 = vst.msk [vmem:[%s1585_s8 + $0x58] sm:$0xf] %vm1086_vm0, %v1076_v50  ;;  %v510_v40 = vmul.f32 %v1866_v1, %v1307_v48  ;;  %v1045_v49 = vadd.f32 %v1013_v61, %v944_v0  ;;  %v844_v57 = vadd.f32 %v812_v25, %v742_v52  ;;  %v1014_v8 = vmul.f32 %v1923_v17, %v1373_v55  ;;  %v1310_v50 = vld [vmem:[%s1479_s26 + $0x170] sm:$0xff] }
  0x83   : > { %v813_v56 = vmul.f32 %v1873_v5, %v1308_v36  ;;  %v642_v11 = vadd.f32 %v610_v13, %v541_v16  ;;  %v440_v14 = vadd.f32 %v408_v7, %v339_v45  ;;  %v611_v15 = vmul.f32 %v1880_v53, %v1340_v39  ;;  %v1343_v45 = vld [vmem:[%s1479_s26 + $0x171] sm:$0xff] }
  0x84   : > { %v207_v58 = vmul.f32 %v1887_v54, %v1306_v9  ;;  %v1077_v10 = vpack.c.bf16 %v1045_v49, %v1045_v49  ;;  %v945_v20 = vadd.f32 %v913_v2, %v844_v57  ;;  %v308_v21 = vmul.f32 %v1893_v63, %v1339_v42 }
  0x85   : > { %v409_v46 = vmul.f32 %v1905_v62, %v1372_v33  ;;  %v743_v23 = vadd.f32 %v711_v59, %v642_v11  ;;  %v914_v24 = vmul.f32 %v1899_v12, %v1341_v47  ;;  %v542_v30 = vadd.f32 %v510_v40, %v440_v14  ;;  %v1342_v33 = vld [vmem:[%s1479_s26 + $0x169] sm:$0xff] }
  0x86   : > { %v712_v32 = vmul.f32 %v1914_v19, %v1373_v55  ;;  %1110 = vst.msk [vmem:[%s1585_s8 + $0x5c] sm:$0xf] %vm1086_vm0, %v1077_v10  ;;  %v1046_v60 = vadd.f32 %v1014_v8, %v945_v20  ;;  %v1015_v9 = vmul.f32 %v1923_v17, %v1374_v18  ;;  %v340_v22 = vadd.f32 %v308_v21, %v207_v58  ;;  %v1311_v58 = vld [vmem:[%s1479_s26 + $0x180] sm:$0xff] }
  0x87   : > { %v511_v34 = vmul.f32 %v1866_v1, %v1308_v36  ;;  %v845_v42 = vadd.f32 %v813_v56, %v743_v23  ;;  %v643_v29 = vadd.f32 %v611_v15, %v542_v30  ;;  %v814_v31 = vmul.f32 %v1873_v5, %v1309_v37  ;;  %v1376_v56 = vld [vmem:[%s1479_s26 + $0x172] sm:$0xff] }
  0x88   : > { %v612_v41 = vmul.f32 %v1880_v53, %v1341_v47  ;;  %v1078_v43 = vpack.c.bf16 %v1046_v60, %v1046_v60  ;;  %v441_v26 = vadd.f32 %v409_v46, %v340_v22  ;;  %v208_v27 = vmul.f32 %v1887_v54, %v1307_v48 }
  0x89   : > { %v309_v44 = vmul.f32 %v1893_v63, %v1340_v39  ;;  %v946_v61 = vadd.f32 %v914_v24, %v845_v42  ;;  %v744_v38 = vadd.f32 %v712_v32, %v643_v29  ;;  %v915_v35 = vmul.f32 %v1899_v12, %v1342_v33  ;;  %v1377_v29 = vld [vmem:[%s1479_s26 + $0x182] sm:$0xff] }
  0x8a   : > { %v410_v51 = vmul.f32 %v1905_v62, %v1373_v55  ;;  %1111 = vst.msk [vmem:[%s1585_s8 + $0x60] sm:$0xf] %vm1086_vm0, %v1078_v43  ;;  %v543_v25 = vadd.f32 %v511_v34, %v441_v26  ;;  %v713_v13 = vmul.f32 %v1914_v19, %v1374_v18  ;;  %v512_v6 = vmul.f32 %v1866_v1, %v1309_v37  ;;  %v1312_v43 = vld [vmem:[%s1479_s26 + $0x188] sm:$0xff] }
  0x8b   : > { %v341_v28 = vadd.f32 %v309_v44, %v208_v27  ;;  %v1047_v48 = vadd.f32 %v1015_v9, %v946_v61  ;;  %v846_v39 = vadd.f32 %v814_v31, %v744_v38  ;;  %v1016_v4 = vmul.f32 %v1923_v17, %v1375_v3 }
  0x8c   : > { %v815_v0 = vmul.f32 %v1873_v5, %v1310_v50  ;;  %v644_v52 = vadd.f32 %v612_v41, %v543_v25  ;;  %v613_v7 = vmul.f32 %v1880_v53, %v1342_v33  ;;  %v209_v55 = vmul.f32 %v1887_v54, %v1308_v36 }
  0x8d   : > { %v442_v2 = vadd.f32 %v410_v51, %v341_v28  ;;  %v1079_v16 = vpack.c.bf16 %v1047_v48, %v1047_v48  ;;  %v947_v59 = vadd.f32 %v915_v35, %v846_v39  ;;  %v310_v40 = vmul.f32 %v1893_v63, %v1341_v47  ;;  %v1345_v28 = vld [vmem:[%s1479_s26 + $0x189] sm:$0xff] }
  0x8e   : > { %v411_v49 = vmul.f32 %v1905_v62, %v1374_v18  ;;  %v745_v57 = vadd.f32 %v713_v13, %v644_v52  ;;  %v916_v8 = vmul.f32 %v1899_v12, %v1343_v45  ;;  %v714_v14 = vmul.f32 %v1914_v19, %v1375_v3  ;;  %v1344_v18 = vld [vmem:[%s1479_s26 + $0x181] sm:$0xff] }
  0x8f   : > { %v544_v11 = vadd.f32 %v512_v6, %v442_v2  ;;  %1112 = vst.msk [vmem:[%s1585_s8 + $0x64] sm:$0xf] %vm1086_vm0, %v1079_v16  ;;  %v1048_v15 = vadd.f32 %v1016_v4, %v947_v59  ;;  %v1017_v36 = vmul.f32 %v1923_v17, %v1376_v56  ;;  %v342_v10 = vadd.f32 %v310_v40, %v209_v55  ;;  %v1313_v6 = vld [vmem:[%s1479_s26 + $0x198] sm:$0xff] }
  0x90   : > { %v513_v20 = vmul.f32 %v1866_v1, %v1310_v50  ;;  %v847_v47 = vadd.f32 %v815_v0, %v745_v57  ;;  %v816_v46 = vmul.f32 %v1873_v5, %v1311_v58  ;;  %v614_v23 = vmul.f32 %v1880_v53, %v1343_v45 }
  0x91   : > { %v645_v21 = vadd.f32 %v613_v7, %v544_v11  ;;  %v1080_v24 = vpack.c.bf16 %v1048_v15, %v1048_v15  ;;  %v443_v30 = vadd.f32 %v411_v49, %v342_v10  ;;  %v210_v32 = vmul.f32 %v1887_v54, %v1309_v37  ;;  %v1379_v49 = vld [vmem:[%s1479_s26 + $0x19a] sm:$0xff] }
  0x92   : > { %v311_v60 = vmul.f32 %v1893_v63, %v1342_v33  ;;  %v948_v9 = vadd.f32 %v916_v8, %v847_v47  ;;  %v917_v34 = vmul.f32 %v1899_v12, %v1344_v18  ;;  %v412_v42 = vmul.f32 %v1905_v62, %v1375_v3  ;;  %v1314_v15 = vld [vmem:[%s1479_s26 + $0x1a0] sm:$0xff] }
  0x93   : > { %v746_v22 = vadd.f32 %v714_v14, %v645_v21  ;;  %1113 = vst.msk [vmem:[%s1585_s8 + $0x68] sm:$0xf] %vm1086_vm0, %v1080_v24  ;;  %v545_v31 = vadd.f32 %v513_v20, %v443_v30  ;;  %v715_v41 = vmul.f32 %v1914_v19, %v1376_v56  ;;  %v514_v37 = vmul.f32 %v1866_v1, %v1311_v58  ;;  %v1347_v47 = vld [vmem:[%s1479_s26 + $0x1a1] sm:$0xff] }
  0x94   : > { %v343_v26 = vadd.f32 %v311_v60, %v210_v32  ;;  %v1049_v27 = vadd.f32 %v1017_v36, %v948_v9  ;;  %v1018_v44 = vmul.f32 %v1923_v17, %v1377_v29  ;;  %v817_v61 = vmul.f32 %v1873_v5, %v1312_v43  ;;  %v1380_v24 = vld [vmem:[%s1479_s26 + $0x1a2] sm:$0xff] }
  0x95   : > { %v848_v33 = vadd.f32 %v816_v46, %v746_v22  ;;  %v646_v38 = vadd.f32 %v614_v23, %v545_v31  ;;  %v615_v51 = vmul.f32 %v1880_v53, %v1344_v18  ;;  %v211_v3 = vmul.f32 %v1887_v54, %v1310_v50  ;;  %v1378_v54 = vld [vmem:[%s1479_s26 + $0x18a] sm:$0xff]  ;;  %v1346_v50 = vld [vmem:[%s1479_s26 + $0x199] sm:$0xff] }
  0x96   : > { %v444_v35 = vadd.f32 %v412_v42, %v343_v26  ;;  %v1081_v25 = vpack.c.bf16 %v1049_v27, %v1049_v27  ;;  %v312_v48 = vmul.f32 %v1893_v63, %v1343_v45  ;;  %v413_v39 = vmul.f32 %v1905_v62, %v1376_v56 }
  0x97   : > { %v949_v13 = vadd.f32 %v917_v34, %v848_v33  ;;  %v747_v4 = vadd.f32 %v715_v41, %v646_v38  ;;  %v918_v0 = vmul.f32 %v1899_v12, %v1345_v28  ;;  %v716_v2 = vmul.f32 %v1914_v19, %v1377_v29 }
  0x98   : > { %v546_v52 = vadd.f32 %v514_v37, %v444_v35  ;;  %1114 = vst.msk [vmem:[%s1585_s8 + $0x6c] sm:$0xf] %vm1086_vm0, %v1081_v25  ;;  %v344_v55 = vadd.f32 %v312_v48, %v211_v3  ;;  %v515_v16 = vmul.f32 %v1866_v1, %v1312_v43  ;;  %v1019_v62 = vmul.f32 %v1923_v17, %v1378_v54 }
  0x99   : > { %v1050_v7 = vadd.f32 %v1018_v44, %v949_v13  ;;  %v849_v63 = vadd.f32 %v817_v61, %v747_v4  ;;  %v818_v45 = vmul.f32 %v1873_v5, %v1313_v6  ;;  %v616_v8 = vmul.f32 %v1880_v53, %v1345_v28 }
  0x9a   : > { %v647_v59 = vadd.f32 %v615_v51, %v546_v52  ;;  %v445_v57 = vadd.f32 %v413_v39, %v344_v55  ;;  %v919_v14 = vmul.f32 %v1899_v12, %v1346_v50  ;;  %v717_v36 = vmul.f32 %v1914_v19, %v1378_v54 }
  0x9b   : > { %v1082_v40 = vpack.c.bf16 %v1050_v7, %v1050_v7  ;;  %v950_v56 = vadd.f32 %v918_v0, %v849_v63  ;;  %v1020_v20 = vmul.f32 %v1923_v17, %v1379_v49  ;;  %v819_v53 = vmul.f32 %v1873_v5, %v1314_v15 }
  0x9c   : > { %v748_v11 = vadd.f32 %v716_v2, %v647_v59  ;;  %v547_v1 = vadd.f32 %v515_v16, %v445_v57  ;;  %v920_v30 = vmul.f32 %v1899_v12, %v1347_v47  ;;  %v1021_v60 = vmul.f32 %v1923_v17, %v1380_v24 }
  0x9d   : > { %1115 = vst.msk [vmem:[%s1585_s8 + $0x70] sm:$0xf] %vm1086_vm0, %v1082_v40  ;;  %v1051_v58 = vadd.f32 %v1019_v62, %v950_v56 }
  0x9e   : > { %v850_v10 = vadd.f32 %v818_v45, %v748_v11  ;;  %v648_v21 = vadd.f32 %v616_v8, %v547_v1 }
  0x9f   : > { %v1083_v46 = vpack.c.bf16 %v1051_v58, %v1051_v58 }
  0xa0   : > { %v951_v23 = vadd.f32 %v919_v14, %v850_v10  ;;  %v749_v18 = vadd.f32 %v717_v36, %v648_v21 }
  0xa1   : > { %1116 = vst.msk [vmem:[%s1585_s8 + $0x74] sm:$0xf] %vm1086_vm0, %v1083_v46 }
  0xa2   : > { %v1052_v32 = vadd.f32 %v1020_v20, %v951_v23  ;;  %v851_v19 = vadd.f32 %v819_v53, %v749_v18 }
  0xa4   : > { %v1084_v9 = vpack.c.bf16 %v1052_v32, %v1052_v32  ;;  %v952_v22 = vadd.f32 %v920_v30, %v851_v19 }
  0xa6   : > { %1117 = vst.msk [vmem:[%s1585_s8 + $0x78] sm:$0xf] %vm1086_vm0, %v1084_v9  ;;  %v1053_v34 = vadd.f32 %v1021_v60, %v952_v22 }
  0xa8   : > { %v1085_v42 = vpack.c.bf16 %v1053_v34, %v1053_v34 }
  0xaa   : > { %1118 = vst.msk [vmem:[%s1585_s8 + $0x7c] sm:$0xf] %vm1086_vm0, %v1085_v42 }
  0xab PF: > { %s12_s9 = sadd.s32 1, %s1418_s9  }
  0xac   : > { %p9_p4 = scmp.ge.s32.totalorder %s12_s9, 4  }
  0xae   :  { %11 = sbr.rel (!%p9_p4) target bundleno = 1 (0x1), region = 68 }

</bundles_post_ra>
